<compile_context>
chip_gen: v6e
topology: v6e:2x2x1
jax: 0.10.0
libtpu: 0.0.40
codegen_flags: <defaults>
</compile_context>

<pallas_src>
import functools

import jax
import jax.numpy as jnp
from jax.experimental import pallas as pl
from jax.experimental.pallas import tpu as pltpu

LATENT = 20
D_IN = 784
HID = 400

# padded (lane-aligned) sizes
D_IN_P = 896   # 7 * 128
HID_P = 512    # 4 * 128
LAT_P = 128    # 1 * 128

WEIGHT_DTYPE = jnp.bfloat16   # bf16 matmul operands, f32 accumulation
ACT_DTYPE = jnp.bfloat16      # streamed activations: x, eps, reconstruction

BATCH_TILE_MAX = 512          # big tiles amortize per-step overhead; ~15 MiB VMEM total
TARGET_TILES = 4              # keep >=4 grid steps at large B (v7x: 2 TCs + pipeline depth)
ROW_ALIGN = 16                # bf16 packs 16 rows per sublane-packed vreg


def _round_up(n, m):
    return ((n + m - 1) // m) * m


def _pad2d(a, rows, cols):
    r, c = a.shape
    return jnp.pad(a, ((0, rows - r), (0, cols - c)))


def vae_kernel(x_ref, eps_ref,
               w1_ref, b1_ref,
               wmv_ref, bmv_ref,
               w2_ref, b2_ref,
               w3_ref, b3_ref,
               out_ref, mv_ref):
    # encode: v = relu(x @ W1 + b1)   (bf16 operands, f32 accumulation)
    v = jnp.dot(x_ref[...], w1_ref[...],
                preferred_element_type=jnp.float32) + b1_ref[...]
    v = jnp.maximum(v, 0.0)

    # fused mu / logvar head: one 256-wide MXU pass, lane-aligned split
    y = jnp.dot(v.astype(WEIGHT_DTYPE), wmv_ref[...],
                preferred_element_type=jnp.float32) + bmv_ref[...]
    mu = y[:, :LAT_P]
    lv = y[:, LAT_P:]

    # reparameterize: z = mu + eps * exp(0.5 * logvar)   (f32 math, exp on EUP)
    z = mu + eps_ref[...] * jnp.exp(lv * 0.5)

    # decode
    h = jnp.dot(z.astype(WEIGHT_DTYPE), w2_ref[...],
                preferred_element_type=jnp.float32) + b2_ref[...]
    h = jnp.maximum(h, 0.0)
    o = jnp.dot(h.astype(WEIGHT_DTYPE), w3_ref[...],
                preferred_element_type=jnp.float32) + b3_ref[...]

    # sigmoid via exp + approx reciprocal: stays in the EUP slot (not VPU divide)
    s = pl.reciprocal(1.0 + jnp.exp(-o), approx=True)

    out_ref[...] = s.astype(out_ref.dtype)   # bf16 writeback (halves output DMA)
    mv_ref[...] = y                          # [bt, 2*LAT_P] f32: mu | logvar


def prepare_params(params):
    """Pad / fuse / cast the nn.Linear parameters ONCE (outside the hot loop)."""
    (w1, b1), (wm, bm), (wv, bv), (w2, b2), (w3, b3) = params
    w1_p = _pad2d(w1, D_IN_P, HID_P).astype(WEIGHT_DTYPE)
    b1_p = _pad2d(b1[None, :], 1, HID_P).astype(jnp.float32)
    # fused mu / logvar head: [HID_P, 2*LAT_P]; mu in cols [:128], lv in [128:]
    wmv_p = jnp.concatenate(
        [_pad2d(wm, HID_P, LAT_P), _pad2d(wv, HID_P, LAT_P)], axis=1
    ).astype(WEIGHT_DTYPE)
    bmv_p = jnp.concatenate(
        [_pad2d(bm[None, :], 1, LAT_P), _pad2d(bv[None, :], 1, LAT_P)], axis=1
    ).astype(jnp.float32)
    w2_p = _pad2d(w2, LAT_P, HID_P).astype(WEIGHT_DTYPE)
    b2_p = _pad2d(b2[None, :], 1, HID_P).astype(jnp.float32)
    w3_p = _pad2d(w3, HID_P, D_IN_P).astype(WEIGHT_DTYPE)
    b3_p = _pad2d(b3[None, :], 1, D_IN_P).astype(jnp.float32)
    return (w1_p, b1_p, wmv_p, bmv_p, w2_p, b2_p, w3_p, b3_p)


def choose_batch_tile(batch):
    """Batch tile: multiple of 16 rows, >= TARGET_TILES grid steps at large B,
    capped at BATCH_TILE_MAX."""
    bt = _round_up(max(1, -(-batch // TARGET_TILES)), ROW_ALIGN)
    bt = max(ROW_ALIGN, min(BATCH_TILE_MAX, bt))
    return bt, _round_up(batch, bt)


def prepare_inputs(x, eps):
    """Pad to lane-aligned shapes and cast to bf16 ONCE (data-pipeline side) so the
    kernel call itself does no extra HBM round trips."""
    batch = x.shape[0]
    bt, b_pad = choose_batch_tile(batch)
    x_p = jnp.pad(x, ((0, b_pad - batch), (0, D_IN_P - D_IN))).astype(ACT_DTYPE)
    eps_p = jnp.pad(eps, ((0, b_pad - batch), (0, LAT_P - LATENT))).astype(ACT_DTYPE)
    return x_p, eps_p, bt


@functools.partial(jax.jit, static_argnames=("bt",))
def vae_forward_padded(x_p, eps_p, prepared, *, bt):
    """x_p: [b_pad, 896] bf16, eps_p: [b_pad, 128] bf16, b_pad % bt == 0.
    Returns padded (reconstruction bf16 [b_pad, 896], mu|logvar f32 [b_pad, 256])."""
    b_pad = x_p.shape[0]
    grid = (b_pad // bt,)
    w1_p, b1_p, wmv_p, bmv_p, w2_p, b2_p, w3_p, b3_p = prepared

    def batch_spec(cols):
        return pl.BlockSpec((bt, cols), lambda i: (i, 0))

    def resident_spec(a):          # weights/biases stay resident across batch tiles
        return pl.BlockSpec(a.shape, lambda i: (0, 0))

    out_p, mv_p = pl.pallas_call(
        vae_kernel,
        out_shape=(
            jax.ShapeDtypeStruct((b_pad, D_IN_P), ACT_DTYPE),        # reconstruction
            jax.ShapeDtypeStruct((b_pad, 2 * LAT_P), jnp.float32),   # mu | logvar
        ),
        grid_spec=pltpu.PrefetchScalarGridSpec(
            num_scalar_prefetch=0,
            grid=grid,
            in_specs=[
                batch_spec(D_IN_P),                      # x
                batch_spec(LAT_P),                       # eps
                resident_spec(w1_p), resident_spec(b1_p),
                resident_spec(wmv_p), resident_spec(bmv_p),
                resident_spec(w2_p), resident_spec(b2_p),
                resident_spec(w3_p), resident_spec(b3_p),
            ],
            out_specs=[
                batch_spec(D_IN_P),
                batch_spec(2 * LAT_P),
            ],
        ),
        compiler_params=pltpu.CompilerParams(
            dimension_semantics=("parallel",),
        ),
    )(x_p, eps_p, w1_p, b1_p, wmv_p, bmv_p, w2_p, b2_p, w3_p, b3_p)

    return out_p, mv_p


def vae_forward(x, eps, prepared):
    """Convenience wrapper matching the torch module: x [B, 784] f32, eps [B, 20] f32.
    For peak throughput, pre-pad/cast in the data pipeline and call vae_forward_padded
    directly, keeping outputs padded for downstream consumers."""
    batch = x.shape[0]
    x_p, eps_p, bt = prepare_inputs(x, eps)
    out_p, mv_p = vae_forward_padded(x_p, eps_p, prepared, bt=bt)
    out = out_p[:batch, :D_IN].astype(jnp.float32)
    means = mv_p[:batch, :LATENT]
    log_vars = mv_p[:batch, LAT_P:LAT_P + LATENT]
    return out, means, log_vars


def init_params(key):
    """Deterministic init mirroring nn.Linear shapes; stored as [in, out]."""
    def linear(k, fan_in, fan_out):
        kw, kb = jax.random.split(k)
        bound = 1.0 / jnp.sqrt(fan_in)
        w = jax.random.uniform(kw, (fan_in, fan_out), jnp.float32, -bound, bound)
        b = jax.random.uniform(kb, (fan_out,), jnp.float32, -bound, bound)
        return w, b

    k1, k2, k3, k4, k5 = jax.random.split(key, 5)
    return (
        linear(k1, D_IN, HID),      # layer1
        linear(k2, HID, LATENT),    # hidden_layer1 (means)
        linear(k3, HID, LATENT),    # hidden_layer2 (log_vars)
        linear(k4, LATENT, HID),    # layer2
        linear(k5, HID, D_IN),      # layer3
    )


def vae_reference(x, eps, params):
    """Pure-JAX reference mirroring the kernel's mixed precision
    (bf16 matmul operands / bf16 eps, f32 accumulation and elementwise math)."""
    (w1, b1), (wm, bm), (wv, bv), (w2, b2), (w3, b3) = params

    def mm(a, w):
        return jnp.dot(a.astype(WEIGHT_DTYPE), w.astype(WEIGHT_DTYPE),
                       preferred_element_type=jnp.float32)

    v = jax.nn.relu(mm(x, w1) + b1)
    mu = mm(v, wm) + bm
    lv = mm(v, wv) + bv
    eps_bf = eps.astype(ACT_DTYPE).astype(jnp.float32)
    z = mu + eps_bf * jnp.exp(0.5 * lv)
    h = jax.nn.relu(mm(z, w2) + b2)
    o = jax.nn.sigmoid(mm(h, w3) + b3)
    return o, mu, lv


if __name__ == "__main__":
    key = jax.random.PRNGKey(0)
    kx, keps, kp = jax.random.split(key, 3)

    B = 8
    x = jax.random.normal(kx, (B, D_IN), jnp.float32)
    eps = jax.random.normal(keps, (B, LATENT), jnp.float32)  # torch.randn_like noise
    params = init_params(kp)
    prepared = prepare_params(params)   # one-time pad / fuse / bf16 cast

    out, means, log_vars = vae_forward(x, eps, prepared)
    jax.block_until_ready((out, means, log_vars))

    ref_out, ref_mu, ref_lv = vae_reference(x, eps, params)
    # bf16 output + approx-reciprocal sigmoid: compare at 1e-2
    assert jnp.allclose(out, ref_out, atol=1e-2, rtol=1e-2)
    assert jnp.allclose(means, ref_mu, atol=1e-2, rtol=1e-2)
    assert jnp.allclose(log_vars, ref_lv, atol=1e-2, rtol=1e-2)

    print("KERNEL_OK")
</pallas_src>

<mosaic_0001>
module attributes {stable_mosaic.version = 11 : i64} {
  func.func @vae_kernel(%arg0: i32, %arg1: memref<16x896xbf16, #tpu.memory_space<vmem>>, %arg2: memref<16x128xbf16, #tpu.memory_space<vmem>>, %arg3: memref<896x512xbf16, #tpu.memory_space<vmem>>, %arg4: memref<1x512xf32, #tpu.memory_space<vmem>>, %arg5: memref<512x256xbf16, #tpu.memory_space<vmem>>, %arg6: memref<1x256xf32, #tpu.memory_space<vmem>>, %arg7: memref<128x512xbf16, #tpu.memory_space<vmem>>, %arg8: memref<1x512xf32, #tpu.memory_space<vmem>>, %arg9: memref<512x896xbf16, #tpu.memory_space<vmem>>, %arg10: memref<1x896xf32, #tpu.memory_space<vmem>>, %arg11: memref<16x896xbf16, #tpu.memory_space<vmem>>, %arg12: memref<16x256xf32, #tpu.memory_space<vmem>>) attributes {dimension_semantics = [#tpu.dimension_semantics<parallel>], iteration_bounds = array<i64: 1>, scalar_prefetch = 0 : i64, scratch_operands = 0 : i64, tpu.core_type = #tpu.core_type<tc>, window_params = [{transform_indices = @transform_0, window_bounds = array<i64: 16, 896>}, {transform_indices = @transform_1, window_bounds = array<i64: 16, 128>}, {pipeline_mode = #tpu.pipeline_mode<synchronous>, transform_indices = @transform_2, window_bounds = array<i64: 896, 512>}, {pipeline_mode = #tpu.pipeline_mode<synchronous>, transform_indices = @transform_3, window_bounds = array<i64: 1, 512>}, {pipeline_mode = #tpu.pipeline_mode<synchronous>, transform_indices = @transform_4, window_bounds = array<i64: 512, 256>}, {pipeline_mode = #tpu.pipeline_mode<synchronous>, transform_indices = @transform_5, window_bounds = array<i64: 1, 256>}, {pipeline_mode = #tpu.pipeline_mode<synchronous>, transform_indices = @transform_6, window_bounds = array<i64: 128, 512>}, {pipeline_mode = #tpu.pipeline_mode<synchronous>, transform_indices = @transform_7, window_bounds = array<i64: 1, 512>}, {pipeline_mode = #tpu.pipeline_mode<synchronous>, transform_indices = @transform_8, window_bounds = array<i64: 512, 896>}, {pipeline_mode = #tpu.pipeline_mode<synchronous>, transform_indices = @transform_9, window_bounds = array<i64: 1, 896>}, {transform_indices = @transform_10, window_bounds = array<i64: 16, 896>}, {transform_indices = @transform_11, window_bounds = array<i64: 16, 256>}]} {
    %c0 = arith.constant 0 : index
    %c0_0 = arith.constant 0 : index
    %0 = vector.load %arg1[%c0, %c0_0] : memref<16x896xbf16, #tpu.memory_space<vmem>>, vector<16x896xbf16>
    %c0_1 = arith.constant 0 : index
    %c0_2 = arith.constant 0 : index
    %1 = vector.load %arg3[%c0_1, %c0_2] : memref<896x512xbf16, #tpu.memory_space<vmem>>, vector<896x512xbf16>
    %cst = arith.constant dense<0.000000e+00> : vector<16x512xf32>
    %2 = tpu.matmul %0, %1, %cst {dimension_numbers = #tpu.dot_dimension_numbers<[1], [0], [0], [1], [0, 0, 1, 1], [], []>} : vector<16x896xbf16>, vector<896x512xbf16>, vector<16x512xf32> -> vector<16x512xf32>
    %c0_3 = arith.constant 0 : index
    %c0_4 = arith.constant 0 : index
    %3 = vector.load %arg4[%c0_3, %c0_4] : memref<1x512xf32, #tpu.memory_space<vmem>>, vector<1x512xf32>
    %4 = vector.broadcast %3 : vector<1x512xf32> to vector<16x512xf32>
    %5 = arith.addf %2, %4 : vector<16x512xf32>
    %cst_5 = arith.constant 0.000000e+00 : f32
    %6 = vector.broadcast %cst_5 : f32 to vector<16x512xf32>
    %7 = arith.maximumf %5, %6 : vector<16x512xf32>
    %8 = arith.truncf %7 : vector<16x512xf32> to vector<16x512xbf16>
    %c0_6 = arith.constant 0 : index
    %c0_7 = arith.constant 0 : index
    %9 = vector.load %arg5[%c0_6, %c0_7] : memref<512x256xbf16, #tpu.memory_space<vmem>>, vector<512x256xbf16>
    %cst_8 = arith.constant dense<0.000000e+00> : vector<16x256xf32>
    %10 = tpu.matmul %8, %9, %cst_8 {dimension_numbers = #tpu.dot_dimension_numbers<[1], [0], [0], [1], [0, 0, 1, 1], [], []>} : vector<16x512xbf16>, vector<512x256xbf16>, vector<16x256xf32> -> vector<16x256xf32>
    %c0_9 = arith.constant 0 : index
    %c0_10 = arith.constant 0 : index
    %11 = vector.load %arg6[%c0_9, %c0_10] : memref<1x256xf32, #tpu.memory_space<vmem>>, vector<1x256xf32>
    %12 = vector.broadcast %11 : vector<1x256xf32> to vector<16x256xf32>
    %13 = arith.addf %10, %12 : vector<16x256xf32>
    %14 = vector.extract_strided_slice %13 {offsets = [0, 0], sizes = [16, 128], strides = [1, 1]} : vector<16x256xf32> to vector<16x128xf32>
    %15 = vector.extract_strided_slice %13 {offsets = [0, 128], sizes = [16, 128], strides = [1, 1]} : vector<16x256xf32> to vector<16x128xf32>
    %c0_11 = arith.constant 0 : index
    %c0_12 = arith.constant 0 : index
    %16 = vector.load %arg2[%c0_11, %c0_12] : memref<16x128xbf16, #tpu.memory_space<vmem>>, vector<16x128xbf16>
    %cst_13 = arith.constant 5.000000e-01 : f32
    %17 = vector.broadcast %cst_13 : f32 to vector<16x128xf32>
    %18 = arith.mulf %15, %17 : vector<16x128xf32>
    %19 = math.exp %18 : vector<16x128xf32>
    %20 = arith.extf %16 : vector<16x128xbf16> to vector<16x128xf32>
    %21 = arith.mulf %20, %19 : vector<16x128xf32>
    %22 = arith.addf %14, %21 : vector<16x128xf32>
    %23 = arith.truncf %22 : vector<16x128xf32> to vector<16x128xbf16>
    %c0_14 = arith.constant 0 : index
    %c0_15 = arith.constant 0 : index
    %24 = vector.load %arg7[%c0_14, %c0_15] : memref<128x512xbf16, #tpu.memory_space<vmem>>, vector<128x512xbf16>
    %cst_16 = arith.constant dense<0.000000e+00> : vector<16x512xf32>
    %25 = tpu.matmul %23, %24, %cst_16 {dimension_numbers = #tpu.dot_dimension_numbers<[1], [0], [0], [1], [0, 0, 1, 1], [], []>} : vector<16x128xbf16>, vector<128x512xbf16>, vector<16x512xf32> -> vector<16x512xf32>
    %c0_17 = arith.constant 0 : index
    %c0_18 = arith.constant 0 : index
    %26 = vector.load %arg8[%c0_17, %c0_18] : memref<1x512xf32, #tpu.memory_space<vmem>>, vector<1x512xf32>
    %27 = vector.broadcast %26 : vector<1x512xf32> to vector<16x512xf32>
    %28 = arith.addf %25, %27 : vector<16x512xf32>
    %cst_19 = arith.constant 0.000000e+00 : f32
    %29 = vector.broadcast %cst_19 : f32 to vector<16x512xf32>
    %30 = arith.maximumf %28, %29 : vector<16x512xf32>
    %31 = arith.truncf %30 : vector<16x512xf32> to vector<16x512xbf16>
    %c0_20 = arith.constant 0 : index
    %c0_21 = arith.constant 0 : index
    %32 = vector.load %arg9[%c0_20, %c0_21] : memref<512x896xbf16, #tpu.memory_space<vmem>>, vector<512x896xbf16>
    %cst_22 = arith.constant dense<0.000000e+00> : vector<16x896xf32>
    %33 = tpu.matmul %31, %32, %cst_22 {dimension_numbers = #tpu.dot_dimension_numbers<[1], [0], [0], [1], [0, 0, 1, 1], [], []>} : vector<16x512xbf16>, vector<512x896xbf16>, vector<16x896xf32> -> vector<16x896xf32>
    %c0_23 = arith.constant 0 : index
    %c0_24 = arith.constant 0 : index
    %34 = vector.load %arg10[%c0_23, %c0_24] : memref<1x896xf32, #tpu.memory_space<vmem>>, vector<1x896xf32>
    %35 = vector.broadcast %34 : vector<1x896xf32> to vector<16x896xf32>
    %36 = arith.addf %33, %35 : vector<16x896xf32>
    %cst_25 = arith.constant 0.000000e+00 : f32
    %37 = vector.broadcast %cst_25 : f32 to vector<16x896xf32>
    %38 = arith.subf %37, %36 : vector<16x896xf32>
    %39 = math.exp %38 : vector<16x896xf32>
    %cst_26 = arith.constant 1.000000e+00 : f32
    %40 = vector.broadcast %cst_26 : f32 to vector<16x896xf32>
    %41 = arith.addf %40, %39 : vector<16x896xf32>
    %42 = tpu.reciprocal %41 {approx = true} : vector<16x896xf32> -> vector<16x896xf32>
    %43 = arith.truncf %42 : vector<16x896xf32> to vector<16x896xbf16>
    %c0_27 = arith.constant 0 : index
    %c0_28 = arith.constant 0 : index
    %44 = vector.load %arg11[%c0_27, %c0_28] : memref<16x896xbf16, #tpu.memory_space<vmem>>, vector<16x896xbf16>
    tpu.vector_store %arg11[%c0_27, %c0_28], %43 {strides = array<i32>} : memref<16x896xbf16, #tpu.memory_space<vmem>>, vector<16x896xbf16>,
    %c0_29 = arith.constant 0 : index
    %c0_30 = arith.constant 0 : index
    %45 = vector.load %arg12[%c0_29, %c0_30] : memref<16x256xf32, #tpu.memory_space<vmem>>, vector<16x256xf32>
    tpu.vector_store %arg12[%c0_29, %c0_30], %13 {strides = array<i32>} : memref<16x256xf32, #tpu.memory_space<vmem>>, vector<16x256xf32>,
    return
  }
  func.func @transform_0(%arg0: i32) -> (i32, i32) {
    %c0_i32 = arith.constant 0 : i32
    %c0_i32_0 = arith.constant 0 : i32
    return %arg0, %c0_i32 : i32, i32
  }
  func.func @transform_1(%arg0: i32) -> (i32, i32) {
    %c0_i32 = arith.constant 0 : i32
    %c0_i32_0 = arith.constant 0 : i32
    return %arg0, %c0_i32 : i32, i32
  }
  func.func @transform_2(%arg0: i32) -> (i32, i32) {
    %c0_i32 = arith.constant 0 : i32
    %c0_i32_0 = arith.constant 0 : i32
    %c0_i32_1 = arith.constant 0 : i32
    return %c0_i32, %c0_i32_0 : i32, i32
  }
  func.func @transform_3(%arg0: i32) -> (i32, i32) {
    %c0_i32 = arith.constant 0 : i32
    %c0_i32_0 = arith.constant 0 : i32
    %c0_i32_1 = arith.constant 0 : i32
    return %c0_i32, %c0_i32_0 : i32, i32
  }
  func.func @transform_4(%arg0: i32) -> (i32, i32) {
    %c0_i32 = arith.constant 0 : i32
    %c0_i32_0 = arith.constant 0 : i32
    %c0_i32_1 = arith.constant 0 : i32
    return %c0_i32, %c0_i32_0 : i32, i32
  }
  func.func @transform_5(%arg0: i32) -> (i32, i32) {
    %c0_i32 = arith.constant 0 : i32
    %c0_i32_0 = arith.constant 0 : i32
    %c0_i32_1 = arith.constant 0 : i32
    return %c0_i32, %c0_i32_0 : i32, i32
  }
  func.func @transform_6(%arg0: i32) -> (i32, i32) {
    %c0_i32 = arith.constant 0 : i32
    %c0_i32_0 = arith.constant 0 : i32
    %c0_i32_1 = arith.constant 0 : i32
    return %c0_i32, %c0_i32_0 : i32, i32
  }
  func.func @transform_7(%arg0: i32) -> (i32, i32) {
    %c0_i32 = arith.constant 0 : i32
    %c0_i32_0 = arith.constant 0 : i32
    %c0_i32_1 = arith.constant 0 : i32
    return %c0_i32, %c0_i32_0 : i32, i32
  }
  func.func @transform_8(%arg0: i32) -> (i32, i32) {
    %c0_i32 = arith.constant 0 : i32
    %c0_i32_0 = arith.constant 0 : i32
    %c0_i32_1 = arith.constant 0 : i32
    return %c0_i32, %c0_i32_0 : i32, i32
  }
  func.func @transform_9(%arg0: i32) -> (i32, i32) {
    %c0_i32 = arith.constant 0 : i32
    %c0_i32_0 = arith.constant 0 : i32
    %c0_i32_1 = arith.constant 0 : i32
    return %c0_i32, %c0_i32_0 : i32, i32
  }
  func.func @transform_10(%arg0: i32) -> (i32, i32) {
    %c0_i32 = arith.constant 0 : i32
    %c0_i32_0 = arith.constant 0 : i32
    return %arg0, %c0_i32 : i32, i32
  }
  func.func @transform_11(%arg0: i32) -> (i32, i32) {
    %c0_i32 = arith.constant 0 : i32
    %c0_i32_0 = arith.constant 0 : i32
    return %arg0, %c0_i32 : i32, i32
  }
}

</mosaic_0001>

<bundles_post_ra>
// kernel: vae_forward_padded.1
= control target key start
LH: loop header
LB: loop body
LE: loop exit
PB: predicated region body
PF: predicated region fallthrough
CT: control target
= control target key end

     0   :  { %17 = vsyncpa [#allocation3], 0  ;;  %s6572_s0 = inlined_call_operand.hbm [shape: bf16[16,896], index: 0, kind: input, shape index: {}]   ;;  %s6573_s1 = inlined_call_operand.hbm [shape: bf16[16,128], index: 1, kind: input, shape index: {}]   ;;  %s6574_s2 = inlined_call_operand.hbm [shape: bf16[896,512], index: 2, kind: input, shape index: {}]   ;;  %s6575_s3 = inlined_call_operand.vmem [shape: f32[1,512], index: 3, kind: input, shape index: {}]   ;;  %s6576_s4 = inlined_call_operand.hbm [shape: bf16[512,256], index: 4, kind: input, shape index: {}]   ;;  %s6577_s5 = inlined_call_operand.vmem [shape: f32[1,256], index: 5, kind: input, shape index: {}]   ;;  %s6578_s6 = inlined_call_operand.hbm [shape: bf16[128,512], index: 6, kind: input, shape index: {}]   ;;  %s6579_s7 = inlined_call_operand.hbm [shape: f32[1,512], index: 7, kind: input, shape index: {}]   ;;  %s6580_s8 = inlined_call_operand.hbm [shape: bf16[512,896], index: 8, kind: input, shape index: {}]   ;;  %s6581_s9 = inlined_call_operand.vmem [shape: f32[1,896], index: 9, kind: input, shape index: {}]   ;;  %s6582_s10 = inlined_call_operand.hbm [shape: bf16[16,896], index: 10, kind: output, shape index: {0}]   ;;  %s6583_s11 = inlined_call_operand.hbm [shape: f32[16,256], index: 11, kind: output, shape index: {1}]  }
   0x1   :  { %18 = vsyncpa [#allocation6], 0 }
   0x2   :  { %19 = vsyncpa [#allocation9], 0 }
   0x3   :  { %20 = vsyncpa [#allocation12], 0 }
   0x4   :  { %21 = vsyncpa [#allocation4], 0 }
   0x5   :  { %22 = vsyncpa [#allocation16], 0  ;;  %s6352_s17 = smov [#allocation5]  }
   0x6   :  { %s40_s18 = sshll.u32 %s6352_s17, 4  ;;  %s41_s18 = int_to_ptr.vmem [resolvable:$true] %s40_s18 }
   0x7   :  { %s6168_s19 = scalar_lea.vmem %s41_s18, 128  ;;  %p6173_p1 = scmp.lt.s32.totalorder %s41_s18, %s41_s18 }
   0x8   :  { %p6169_p0 = scmp.ne.s32.totalorder %s41_s18, %s6168_s19  ;;  %p6174_p2 = scmp.lt.s32.totalorder %s6168_s19, %s6168_s19 }
   0xa   :  { %p6175_p3 = por %p6174_p2, %p6173_p1 }
   0xc   :  { %p6176_p4 = pnand %p6175_p3, %p6169_p0 }
   0xe   :  { %6179 = shalt.err (!%p6176_p4)
}
   0xf   :  { %s6353_s20 = smov 64   ;;  %s6354_s21 = smov 4  }
  0x10   :  { %46 = dma.hbm_to_vmem [thread:$0]  %s6573_s1, 128, %s41_s18, [#allocation6], %s6353_s20, %s6353_s20, %s6354_s21  }
  0x11   :  { %s6355_s24 = smov [#allocation8]  }
  0x12   :  { %s66_s25 = sshll.u32 %s6355_s24, 4  ;;  %s67_s25 = int_to_ptr.vmem [resolvable:$true] %s66_s25 }
  0x13   :  { %s6188_s26 = scalar_lea.vmem %s67_s25, 8192  ;;  %p6193_p6 = scmp.lt.s32.totalorder %s67_s25, %s67_s25 }
  0x14   :  { %p6189_p5 = scmp.ne.s32.totalorder %s67_s25, %s6188_s26  ;;  %p6194_p7 = scmp.lt.s32.totalorder %s6188_s26, %s6188_s26 }
  0x16   :  { %p6195_p8 = por %p6194_p7, %p6193_p6 }
  0x18   :  { %p6196_p9 = pnand %p6195_p8, %p6189_p5 }
  0x1a   :  { %6199 = shalt.err (!%p6196_p9)
}
  0x1b   :  { %s6356_s27 = smov 128   ;;  %s6357_s28 = smov 8  }
  0x1c   :  { %72 = dma.hbm_to_vmem [thread:$0]  %s6576_s4, 8192, %s67_s25, [#allocation9], %s6356_s27, %s6356_s27, %s6357_s28  }
  0x1d   :  { %s6358_s12 = smov [#allocation11]   ;;  %s6359_s14 = smov [#allocation2]  }
  0x1e   :  { %s93_s13 = sshll.u32 %s6358_s12, 4  ;;  %s28_s1 = sshll.u32 %s6359_s14, 4  ;;  %s94_s13 = int_to_ptr.vmem [resolvable:$true] %s93_s13  ;;  %s29_s1 = int_to_ptr.vmem [resolvable:$true] %s28_s1 }
  0x1f   :  { %s6208_s15 = scalar_lea.vmem %s94_s13, 64  ;;  %p6213_p11 = scmp.lt.s32.totalorder %s94_s13, %s94_s13 }
  0x20   :  { %p6209_p10 = scmp.ne.s32.totalorder %s94_s13, %s6208_s15  ;;  %p6214_p12 = scmp.lt.s32.totalorder %s6208_s15, %s6208_s15 }
  0x22   :  { %p6215_p13 = por %p6214_p12, %p6213_p11 }
  0x24   :  { %p6216_p0 = pnand %p6215_p13, %p6209_p10 }
  0x26   :  { %6219 = shalt.err (!%p6216_p0)
}
  0x27   :  { %96 = dma.hbm_to_vmem [thread:$0]  %s6579_s7, 64, %s94_s13, [#allocation12]  }
  0x28   :  { %s6228_s18 = scalar_lea.vmem %s29_s1, 896  ;;  %p6233_p2 = scmp.lt.s32.totalorder %s29_s1, %s29_s1 }
  0x29   :  { %p6229_p1 = scmp.ne.s32.totalorder %s29_s1, %s6228_s18  ;;  %p6234_p3 = scmp.lt.s32.totalorder %s6228_s18, %s6228_s18 }
  0x2b   :  { %p6235_p4 = por %p6234_p3, %p6233_p2 }
  0x2d   :  { %p6236_p5 = pnand %p6235_p4, %p6229_p1 }
  0x2f   :  { %6239 = shalt.err (!%p6236_p5)
}
  0x30   :  { %s6360_s4 = smov 448   ;;  %s6361_s19 = smov 28  }
  0x31   :  { %34 = dma.hbm_to_vmem [thread:$0]  %s6572_s0, 896, %s29_s1, [#allocation3], %s6360_s4, %s6360_s4, %s6361_s19  }
  0x32   :  { %s6362_s22 = smov [#allocation7]  }
  0x33   :  { %s52_s23 = sshll.u32 %s6362_s22, 4  ;;  %s53_s23 = int_to_ptr.vmem [resolvable:$true] %s52_s23 }
  0x34   :  { %s6248_s7 = scalar_lea.vmem %s53_s23, 28672  ;;  %p6253_p7 = scmp.lt.s32.totalorder %s53_s23, %s53_s23 }
  0x35   :  { %p6249_p6 = scmp.ne.s32.totalorder %s53_s23, %s6248_s7  ;;  %p6254_p8 = scmp.lt.s32.totalorder %s6248_s7, %s6248_s7 }
  0x37   :  { %p6255_p9 = por %p6254_p8, %p6253_p7 }
  0x39   :  { %p6256_p10 = pnand %p6255_p9, %p6249_p6 }
  0x3b   :  { %6259 = shalt.err (!%p6256_p10)
}
  0x3c   :  { %s6363_s24 = smov 256   ;;  %s6364_s25 = smov 16  }
  0x3d   :  { %58 = dma.hbm_to_vmem [thread:$0]  %s6574_s2, 28672, %s53_s23, [#allocation6], %s6363_s24, %s6363_s24, %s6364_s25  }
  0x3e   :  { %s6365_s0 = smov [#allocation10]   ;;  %s6366_s29 = smov [#allocation13]  }
  0x3f   :  { %s80_s28 = sshll.u32 %s6365_s0, 4  ;;  %s102_s30 = sshll.u32 %s6366_s29, 4  ;;  %s81_s28 = int_to_ptr.vmem [resolvable:$true] %s80_s28  ;;  %s103_s30 = int_to_ptr.vmem [resolvable:$true] %s102_s30 }
  0x40   :  { %s6268_s12 = scalar_lea.vmem %s81_s28, 4096  ;;  %p6273_p12 = scmp.lt.s32.totalorder %s81_s28, %s81_s28 }
  0x41   :  { %p6269_p11 = scmp.ne.s32.totalorder %s81_s28, %s6268_s12  ;;  %p6274_p13 = scmp.lt.s32.totalorder %s6268_s12, %s6268_s12 }
  0x43   :  { %p6275_p0 = por %p6274_p13, %p6273_p12 }
  0x45   :  { %p6276_p1 = pnand %p6275_p0, %p6269_p11 }
  0x47   :  { %6279 = shalt.err (!%p6276_p1)
}
  0x48   :  { %86 = dma.hbm_to_vmem [thread:$0]  %s6578_s6, 4096, %s81_s28, [#allocation9], %s6363_s24, %s6363_s24, %s6364_s25  }
  0x49   :  { %s6288_s2 = scalar_lea.vmem %s103_s30, 28672  ;;  %p6293_p3 = scmp.lt.s32.totalorder %s103_s30, %s103_s30 }
  0x4a   :  { %p6289_p2 = scmp.ne.s32.totalorder %s103_s30, %s6288_s2  ;;  %p6294_p4 = scmp.lt.s32.totalorder %s6288_s2, %s6288_s2 }
  0x4c   :  { %p6295_p5 = por %p6294_p4, %p6293_p3 }
  0x4e   :  { %p6296_p6 = pnand %p6295_p5, %p6289_p2 }
  0x50   :  { %6299 = shalt.err (!%p6296_p6)
}
  0x51   :  { %108 = dma.hbm_to_vmem [thread:$0]  %s6580_s8, 28672, %s103_s30, [#allocation12], %s6360_s4, %s6360_s4, %s6361_s19  }
  0x52   :  { %6340 = dma.done.wait [#allocation3], 896  }
  0x53   :  { %6341 = vsyncadd [#allocation3], 4294966400 }
  0x54   :  { %6342 = dma.done.wait [#allocation6], 28800  }
  0x55   :  { %6343 = vsyncadd [#allocation6], 4294938496 }
  0x56   :  { %6344 = dma.done.wait [#allocation9], 12288  }
  0x57   :  { %6345 = vsyncadd [#allocation9], 4294955008 }
  0x58   :  { %6346 = dma.done.wait [#allocation12], 28736  }
  0x59   :  { %6347 = vsyncadd [#allocation12], 4294938560  ;;  %v5288_v0 = vld [vmem:[#allocation7 + $0xe4] ss:$16 sps:$4 sm:$0xff]   ;;  %v5292_v2 = vld [vmem:[#allocation7 + $0xe0] ss:$16 sps:$4 sm:$0xff]  }
  0x5a   :  { %v5290_v1 = vld [vmem:[#allocation7 + $0x2e4] ss:$16 sps:$4 sm:$0xff]   ;;  %1543 = vmatprep.subr.bf16.mxu0 %v5288_v0  ;;  %v5293_v3 = vld [vmem:[#allocation7 + $0x2e0] ss:$16 sps:$4 sm:$0xff]   ;;  %v6465_v51 = vld [vmem:[#allocation2 + $0xc] ss:$28 sps:$4 sm:$0xff]  }
  0x5b   :  { %1586 = vmatprep.subr.bf16.mxu1 %v5290_v1  ;;  %v5294_v4 = vld [vmem:[#allocation7 + $0xc4] ss:$16 sps:$4 sm:$0xff]   ;;  %1544 = vmatpush1.bf16.msra.mxu0 %v5292_v2  ;;  %v5298_v6 = vld [vmem:[#allocation7 + $0xc0] ss:$16 sps:$4 sm:$0xff]  }
  0x5c   :  { %1587 = vmatpush1.bf16.msra.mxu1 %v5293_v3  ;;  %v5296_v5 = vld [vmem:[#allocation7 + $0x2c4] ss:$16 sps:$4 sm:$0xff]   ;;  %1545 = vmatprep.subr.bf16.mxu0 %v5294_v4  ;;  %v5299_v7 = vld [vmem:[#allocation7 + $0x2c0] ss:$16 sps:$4 sm:$0xff]  }
  0x5d   :  { %1588 = vmatprep.subr.bf16.mxu1 %v5296_v5  ;;  %v5300_v8 = vld [vmem:[#allocation7 + $0xa4] ss:$16 sps:$4 sm:$0xff]   ;;  %v5304_v10 = vld [vmem:[#allocation7 + $0xa0] ss:$16 sps:$4 sm:$0xff]   ;;  %1618 = vmatprep.mubr.bf16.mxu1 %v6465_v51 }
  0x5e   :  { %v5302_v9 = vld [vmem:[#allocation7 + $0x2a4] ss:$16 sps:$4 sm:$0xff]   ;;  %v5305_v11 = vld [vmem:[#allocation7 + $0x2a0] ss:$16 sps:$4 sm:$0xff]  }
  0x5f   :  { %1546 = vmatpush1.bf16.msra.mxu0 %v5298_v6  ;;  %v5306_v12 = vld [vmem:[#allocation7 + $0x84] ss:$16 sps:$4 sm:$0xff]   ;;  %v5310_v14 = vld [vmem:[#allocation7 + $0x80] ss:$16 sps:$4 sm:$0xff]  }
  0x60   :  { %1589 = vmatpush1.bf16.msra.mxu1 %v5299_v7  ;;  %1547 = vmatprep.subr.bf16.mxu0 %v5300_v8  ;;  %v5308_v13 = vld [vmem:[#allocation7 + $0x284] ss:$16 sps:$4 sm:$0xff]   ;;  %v5311_v15 = vld [vmem:[#allocation7 + $0x280] ss:$16 sps:$4 sm:$0xff]  }
  0x61   :  { %1590 = vmatprep.subr.bf16.mxu1 %v5302_v9  ;;  %v5312_v16 = vld [vmem:[#allocation7 + $0x64] ss:$16 sps:$4 sm:$0xff]   ;;  %v5316_v18 = vld [vmem:[#allocation7 + $0x60] ss:$16 sps:$4 sm:$0xff]  }
  0x62   :  { %v5314_v17 = vld [vmem:[#allocation7 + $0x264] ss:$16 sps:$4 sm:$0xff]   ;;  %v5317_v19 = vld [vmem:[#allocation7 + $0x260] ss:$16 sps:$4 sm:$0xff]  }
  0x63   :  { %1548 = vmatpush1.bf16.msra.mxu0 %v5304_v10  ;;  %v5318_v20 = vld [vmem:[#allocation7 + $0x44] ss:$16 sps:$4 sm:$0xff]   ;;  %v5322_v22 = vld [vmem:[#allocation7 + $0x40] ss:$16 sps:$4 sm:$0xff]  }
  0x64   :  { %1591 = vmatpush1.bf16.msra.mxu1 %v5305_v11  ;;  %1549 = vmatprep.subr.bf16.mxu0 %v5306_v12  ;;  %v5320_v21 = vld [vmem:[#allocation7 + $0x244] ss:$16 sps:$4 sm:$0xff]   ;;  %v5323_v23 = vld [vmem:[#allocation7 + $0x240] ss:$16 sps:$4 sm:$0xff]  }
  0x65   :  { %1592 = vmatprep.subr.bf16.mxu1 %v5308_v13  ;;  %v5324_v24 = vld [vmem:[#allocation7 + $0x24] ss:$16 sps:$4 sm:$0xff]   ;;  %v5328_v26 = vld [vmem:[#allocation7 + $0x20] ss:$16 sps:$4 sm:$0xff]  }
  0x66   :  { %v5326_v25 = vld [vmem:[#allocation7 + $0x224] ss:$16 sps:$4 sm:$0xff]   ;;  %v5329_v27 = vld [vmem:[#allocation7 + $0x220] ss:$16 sps:$4 sm:$0xff]  }
  0x67   :  { %1550 = vmatpush1.bf16.msra.mxu0 %v5310_v14  ;;  %v5330_v28 = vld [vmem:[#allocation7 + $0x4] ss:$16 sps:$4 sm:$0xff]   ;;  %v5334_v30 = vld [vmem:[#allocation7] ss:$16 sps:$4 sm:$0xff]   ;;  %v6367_v14 = vmov 0  }
  0x68   :  { %1593 = vmatpush1.bf16.msra.mxu1 %v5311_v15  ;;  %1551 = vmatprep.subr.bf16.mxu0 %v5312_v16  ;;  %v5332_v29 = vld [vmem:[#allocation7 + $0x204] ss:$16 sps:$4 sm:$0xff]   ;;  %v5335_v31 = vld [vmem:[#allocation7 + $0x200] ss:$16 sps:$4 sm:$0xff]  }
  0x69   :  { %1594 = vmatprep.subr.bf16.mxu1 %v5314_v17  ;;  %v5336_v32 = vld [vmem:[#allocation7 + $0x1e4] ss:$16 sps:$4 sm:$0xff]   ;;  %v5340_v34 = vld [vmem:[#allocation7 + $0x1e0] ss:$16 sps:$4 sm:$0xff]  }
  0x6a   :  { %v5338_v33 = vld [vmem:[#allocation7 + $0x3e4] ss:$16 sps:$4 sm:$0xff]   ;;  %v5341_v35 = vld [vmem:[#allocation7 + $0x3e0] ss:$16 sps:$4 sm:$0xff]  }
  0x6b   :  { %1552 = vmatpush1.bf16.msra.mxu0 %v5316_v18  ;;  %v5342_v36 = vld [vmem:[#allocation7 + $0x1c4] ss:$16 sps:$4 sm:$0xff]   ;;  %v5346_v38 = vld [vmem:[#allocation7 + $0x1c0] ss:$16 sps:$4 sm:$0xff]  }
  0x6c   :  { %1595 = vmatpush1.bf16.msra.mxu1 %v5317_v19  ;;  %1553 = vmatprep.subr.bf16.mxu0 %v5318_v20  ;;  %v5344_v37 = vld [vmem:[#allocation7 + $0x3c4] ss:$16 sps:$4 sm:$0xff]   ;;  %v5347_v39 = vld [vmem:[#allocation7 + $0x3c0] ss:$16 sps:$4 sm:$0xff]  }
  0x6d   :  { %1596 = vmatprep.subr.bf16.mxu1 %v5320_v21  ;;  %v5348_v40 = vld [vmem:[#allocation7 + $0x1a4] ss:$16 sps:$4 sm:$0xff]   ;;  %v5352_v42 = vld [vmem:[#allocation7 + $0x1a0] ss:$16 sps:$4 sm:$0xff]  }
  0x6e   :  { %v5350_v41 = vld [vmem:[#allocation7 + $0x3a4] ss:$16 sps:$4 sm:$0xff]   ;;  %v5353_v43 = vld [vmem:[#allocation7 + $0x3a0] ss:$16 sps:$4 sm:$0xff]  }
  0x6f   :  { %1554 = vmatpush1.bf16.msra.mxu0 %v5322_v22  ;;  %v5354_v44 = vld [vmem:[#allocation7 + $0x184] ss:$16 sps:$4 sm:$0xff]   ;;  %v5358_v46 = vld [vmem:[#allocation7 + $0x180] ss:$16 sps:$4 sm:$0xff]  }
  0x70   :  { %1597 = vmatpush1.bf16.msra.mxu1 %v5323_v23  ;;  %1555 = vmatprep.subr.bf16.mxu0 %v5324_v24  ;;  %v5356_v45 = vld [vmem:[#allocation7 + $0x384] ss:$16 sps:$4 sm:$0xff]   ;;  %v5359_v47 = vld [vmem:[#allocation7 + $0x380] ss:$16 sps:$4 sm:$0xff]  }
  0x71   :  { %1598 = vmatprep.subr.bf16.mxu1 %v5326_v25  ;;  %v5360_v48 = vld [vmem:[#allocation7 + $0x164] ss:$16 sps:$4 sm:$0xff]   ;;  %v5364_v52 = vld [vmem:[#allocation7 + $0x160] ss:$16 sps:$4 sm:$0xff]  }
  0x72   :  { %v6463_v49 = vld [vmem:[#allocation2 + $0x4] ss:$28 sps:$4 sm:$0xff]  }
  0x73   :  { %1556 = vmatpush1.bf16.msra.mxu0 %v5328_v26  ;;  %v5362_v50 = vld [vmem:[#allocation7 + $0x364] ss:$16 sps:$4 sm:$0xff]   ;;  %1575 = vmatprep.mubr.bf16.mxu0 %v6463_v49  ;;  %v5365_v53 = vld [vmem:[#allocation7 + $0x360] ss:$16 sps:$4 sm:$0xff]  }
  0x74   :  { %1599 = vmatpush1.bf16.msra.mxu1 %v5329_v27  ;;  %1557 = vmatprep.subr.bf16.mxu0 %v5330_v28  ;;  %v5366_v54 = vld [vmem:[#allocation7 + $0x144] ss:$16 sps:$4 sm:$0xff]   ;;  %v5370_v56 = vld [vmem:[#allocation7 + $0x140] ss:$16 sps:$4 sm:$0xff]  }
  0x75   :  { %1600 = vmatprep.subr.bf16.mxu1 %v5332_v29  ;;  %v5368_v55 = vld [vmem:[#allocation7 + $0x344] ss:$16 sps:$4 sm:$0xff]   ;;  %v5371_v57 = vld [vmem:[#allocation7 + $0x340] ss:$16 sps:$4 sm:$0xff]  }
  0x76   :  { %v5372_v58 = vld [vmem:[#allocation7 + $0x124] ss:$16 sps:$4 sm:$0xff]   ;;  %v5376_v60 = vld [vmem:[#allocation7 + $0x120] ss:$16 sps:$4 sm:$0xff]  }
  0x77   :  { %1558 = vmatpush1.bf16.msra.mxu0 %v5334_v30  ;;  %v5374_v59 = vld [vmem:[#allocation7 + $0x324] ss:$16 sps:$4 sm:$0xff]   ;;  %v5377_v61 = vld [vmem:[#allocation7 + $0x320] ss:$16 sps:$4 sm:$0xff]  }
  0x78   :  { %1601 = vmatpush1.bf16.msra.mxu1 %v5335_v31  ;;  %1559 = vmatprep.subr.bf16.mxu0 %v5336_v32  ;;  %v5378_v62 = vld [vmem:[#allocation7 + $0x104] ss:$16 sps:$4 sm:$0xff]   ;;  %v5382_v0 = vld [vmem:[#allocation7 + $0x100] ss:$16 sps:$4 sm:$0xff]  }
  0x79   :  { %1602 = vmatprep.subr.bf16.mxu1 %v5338_v33  ;;  %v5380_v63 = vld [vmem:[#allocation7 + $0x304] ss:$16 sps:$4 sm:$0xff]   ;;  %v5383_v1 = vld [vmem:[#allocation7 + $0x300] ss:$16 sps:$4 sm:$0xff]  }
  0x7a   :  { %v5392_v2 = vld [vmem:[#allocation7 + $0x4e4] ss:$16 sps:$4 sm:$0xff]   ;;  %v6469_v4 = vld [vmem:[#allocation2] ss:$28 sps:$4 sm:$0xff]  }
  0x7b   :  { %1560 = vmatpush2.bf16.msra.mxu0 %v5340_v34  ;;  %v5395_v3 = vld [vmem:[#allocation7 + $0x6e4] ss:$16 sps:$4 sm:$0xff]   ;;  %v5390_v6 = vld [vmem:[#allocation7 + $0x4e0] ss:$16 sps:$4 sm:$0xff]  }
  0x7c   :  { %1603 = vmatpush2.bf16.msra.mxu1 %v5341_v35  ;;  %1561 = vmatprep.subr.bf16.mxu0 %v5342_v36  ;;  %v5387_v5 = vld [vmem:[#allocation2 + $0x8] ss:$28 sps:$4 sm:$0xff]   ;;  %v5393_v7 = vld [vmem:[#allocation7 + $0x6e0] ss:$16 sps:$4 sm:$0xff]  }
  0x7d   :  { %1604 = vmatprep.subr.bf16.mxu1 %v5344_v37  ;;  %v5398_v8 = vld [vmem:[#allocation7 + $0x4c4] ss:$16 sps:$4 sm:$0xff]   ;;  %v5396_v10 = vld [vmem:[#allocation7 + $0x4c0] ss:$16 sps:$4 sm:$0xff]  }
  0x7e   :  { %v5401_v9 = vld [vmem:[#allocation7 + $0x6c4] ss:$16 sps:$4 sm:$0xff]   ;;  %v5399_v11 = vld [vmem:[#allocation7 + $0x6c0] ss:$16 sps:$4 sm:$0xff]  }
  0x7f   :  { %1562 = vmatpush2.bf16.msra.mxu0 %v5346_v38  ;;  %v5404_v12 = vld [vmem:[#allocation7 + $0x4a4] ss:$16 sps:$4 sm:$0xff]   ;;  %v5402_v15 = vld [vmem:[#allocation7 + $0x4a0] ss:$16 sps:$4 sm:$0xff]  }
  0x80   :  { %1605 = vmatpush2.bf16.msra.mxu1 %v5347_v39  ;;  %1563 = vmatprep.subr.bf16.mxu0 %v5348_v40  ;;  %v5407_v13 = vld [vmem:[#allocation7 + $0x6a4] ss:$16 sps:$4 sm:$0xff]   ;;  %v5405_v16 = vld [vmem:[#allocation7 + $0x6a0] ss:$16 sps:$4 sm:$0xff]   ;;  %v5444_v39 = vld [vmem:[#allocation7 + $0xec] ss:$16 sps:$4 sm:$0xff]  }
  0x81   :  { %1606 = vmatprep.subr.bf16.mxu1 %v5350_v41  ;;  %v5410_v17 = vld [vmem:[#allocation7 + $0x484] ss:$16 sps:$4 sm:$0xff]   ;;  %v5408_v19 = vld [vmem:[#allocation7 + $0x480] ss:$16 sps:$4 sm:$0xff]  }
  0x82   :  { %v5413_v18 = vld [vmem:[#allocation7 + $0x684] ss:$16 sps:$4 sm:$0xff]   ;;  %v5411_v20 = vld [vmem:[#allocation7 + $0x680] ss:$16 sps:$4 sm:$0xff]  }
  0x83   :  { %1564 = vmatpush2.bf16.msra.mxu0 %v5352_v42  ;;  %v5416_v21 = vld [vmem:[#allocation7 + $0x464] ss:$16 sps:$4 sm:$0xff]   ;;  %v5414_v23 = vld [vmem:[#allocation7 + $0x460] ss:$16 sps:$4 sm:$0xff]   ;;  %v5442_v42 = vld [vmem:[#allocation7 + $0xe8] ss:$16 sps:$4 sm:$0xff]  }
  0x84   :  { %1607 = vmatpush2.bf16.msra.mxu1 %v5353_v43  ;;  %1565 = vmatprep.subr.bf16.mxu0 %v5354_v44  ;;  %v5419_v22 = vld [vmem:[#allocation7 + $0x664] ss:$16 sps:$4 sm:$0xff]   ;;  %v5417_v24 = vld [vmem:[#allocation7 + $0x660] ss:$16 sps:$4 sm:$0xff]   ;;  %v5450_v44 = vld [vmem:[#allocation7 + $0xcc] ss:$16 sps:$4 sm:$0xff]  }
  0x85   :  { %1608 = vmatprep.subr.bf16.mxu1 %v5356_v45  ;;  %v5422_v25 = vld [vmem:[#allocation7 + $0x444] ss:$16 sps:$4 sm:$0xff]   ;;  %v5420_v27 = vld [vmem:[#allocation7 + $0x440] ss:$16 sps:$4 sm:$0xff]  }
  0x86   :  { %v5425_v26 = vld [vmem:[#allocation7 + $0x644] ss:$16 sps:$4 sm:$0xff]   ;;  %v5423_v28 = vld [vmem:[#allocation7 + $0x640] ss:$16 sps:$4 sm:$0xff]  }
  0x87   :  { %1566 = vmatpush2.bf16.msra.mxu0 %v5358_v46  ;;  %v5428_v29 = vld [vmem:[#allocation7 + $0x424] ss:$16 sps:$4 sm:$0xff]   ;;  %v5426_v31 = vld [vmem:[#allocation7 + $0x420] ss:$16 sps:$4 sm:$0xff]   ;;  %v5448_v46 = vld [vmem:[#allocation7 + $0xc8] ss:$16 sps:$4 sm:$0xff]  }
  0x88   :  { %1609 = vmatpush2.bf16.msra.mxu1 %v5359_v47  ;;  %1567 = vmatprep.subr.bf16.mxu0 %v5360_v48  ;;  %v5431_v30 = vld [vmem:[#allocation7 + $0x624] ss:$16 sps:$4 sm:$0xff]   ;;  %v5429_v32 = vld [vmem:[#allocation7 + $0x620] ss:$16 sps:$4 sm:$0xff]   ;;  %v5456_v48 = vld [vmem:[#allocation7 + $0xac] ss:$16 sps:$4 sm:$0xff]  }
  0x89   :  { %1610 = vmatprep.subr.bf16.mxu1 %v5362_v50  ;;  %v5434_v33 = vld [vmem:[#allocation7 + $0x404] ss:$16 sps:$4 sm:$0xff]   ;;  %v5432_v36 = vld [vmem:[#allocation7 + $0x400] ss:$16 sps:$4 sm:$0xff]  }
  0x8a   :  { %v5437_v34 = vld [vmem:[#allocation7 + $0x604] ss:$16 sps:$4 sm:$0xff]   ;;  %v5435_v37 = vld [vmem:[#allocation7 + $0x600] ss:$16 sps:$4 sm:$0xff]  }
  0x8b   :  { %1568 = vmatpush2.bf16.msra.mxu0 %v5364_v52  ;;  %v6473_v35 = vld [vmem:[#allocation2 + $0x14] ss:$28 sps:$4 sm:$0xff]   ;;  %v5454_v52 = vld [vmem:[#allocation7 + $0xa8] ss:$16 sps:$4 sm:$0xff]  }
  0x8c   :  { %1611 = vmatpush2.bf16.msra.mxu1 %v5365_v53  ;;  %1569 = vmatprep.subr.bf16.mxu0 %v5366_v54  ;;  %v5440_v38 = vld [vmem:[#allocation7 + $0x5e4] ss:$16 sps:$4 sm:$0xff]   ;;  %v5438_v40 = vld [vmem:[#allocation7 + $0x5e0] ss:$16 sps:$4 sm:$0xff]   ;;  %v5462_v54 = vld [vmem:[#allocation7 + $0x8c] ss:$16 sps:$4 sm:$0xff]  }
  0x8d   :  { %1612 = vmatprep.subr.bf16.mxu1 %v5368_v55  ;;  %v5441_v41 = vld [vmem:[#allocation2 + $0x18] ss:$28 sps:$4 sm:$0xff]   ;;  %v5445_v45 = vld [vmem:[#allocation7 + $0x5c0] ss:$16 sps:$4 sm:$0xff]  }
  0x8e   :  { %v5447_v43 = vld [vmem:[#allocation7 + $0x5c4] ss:$16 sps:$4 sm:$0xff]   ;;  %v5451_v50 = vld [vmem:[#allocation7 + $0x5a0] ss:$16 sps:$4 sm:$0xff]  }
  0x8f   :  { %1570 = vmatpush2.bf16.msra.mxu0 %v5370_v56  ;;  %v5453_v47 = vld [vmem:[#allocation7 + $0x5a4] ss:$16 sps:$4 sm:$0xff]   ;;  %v5457_v55 = vld [vmem:[#allocation7 + $0x580] ss:$16 sps:$4 sm:$0xff]   ;;  %v5460_v56 = vld [vmem:[#allocation7 + $0x88] ss:$16 sps:$4 sm:$0xff]  }
  0x90   :  { %1613 = vmatpush2.bf16.msra.mxu1 %v5371_v57  ;;  %1571 = vmatprep.subr.bf16.mxu0 %v5372_v58  ;;  %v5459_v53 = vld [vmem:[#allocation7 + $0x584] ss:$16 sps:$4 sm:$0xff]   ;;  %v5468_v58 = vld [vmem:[#allocation7 + $0x6c] ss:$16 sps:$4 sm:$0xff]  }
  0x91   :  { %1614 = vmatprep.subr.bf16.mxu1 %v5374_v59  ;;  %v5465_v57 = vld [vmem:[#allocation7 + $0x564] ss:$16 sps:$4 sm:$0xff]   ;;  %v5463_v59 = vld [vmem:[#allocation7 + $0x560] ss:$16 sps:$4 sm:$0xff]  }
  0x93   :  { %1572 = vmatpush2.bf16.msra.mxu0 %v5376_v60  ;;  %v5471_v60 = vld [vmem:[#allocation7 + $0x544] ss:$16 sps:$4 sm:$0xff]  }
  0x94   :  { %1615 = vmatpush2.bf16.msra.mxu1 %v5377_v61  ;;  %1573 = vmatprep.subr.bf16.mxu0 %v5378_v62  ;;  %v5474_v61 = vld [vmem:[#allocation7 + $0x4c] ss:$16 sps:$4 sm:$0xff]   ;;  %v5469_v62 = vld [vmem:[#allocation7 + $0x540] ss:$16 sps:$4 sm:$0xff]  }
  0x95   :  { %1616 = vmatprep.subr.bf16.mxu1 %v5380_v63  ;;  %v5472_v63 = vld [vmem:[#allocation7 + $0x48] ss:$16 sps:$4 sm:$0xff]  }
  0x97   :  { %1574 = vmatpush2.bf16.msra.mxu0 %v5382_v0  ;;  %v5477_v0 = vld [vmem:[#allocation7 + $0x524] ss:$16 sps:$4 sm:$0xff]  }
  0x98   :  { %1617 = vmatpush2.bf16.msra.mxu1 %v5383_v1  ;;  %1629 = vmatprep.subr.bf16.mxu0 %v5392_v2  ;;  %v5480_v1 = vld [vmem:[#allocation7 + $0x2c] ss:$16 sps:$4 sm:$0xff]   ;;  %v5475_v2 = vld [vmem:[#allocation7 + $0x520] ss:$16 sps:$4 sm:$0xff]  }
  0x99   :  { %1672 = vmatprep.subr.bf16.mxu1 %v5395_v3  ;;  %v5478_v3 = vld [vmem:[#allocation7 + $0x28] ss:$16 sps:$4 sm:$0xff]  }
  0x9a   :  { %1576 = vmatmul.mubr.bf16.vlgmr.msra.gmra.mxu0 %v6469_v4 }
  0x9b   :  { %1619 = vmatmul.mubr.bf16.vlgmr.msra.gmra.mxu1 %v5387_v5  ;;  %1630 = vmatpush1.bf16.msra.mxu0 %v5390_v6  ;;  %v5483_v5 = vld [vmem:[#allocation7 + $0x504] ss:$16 sps:$4 sm:$0xff]   ;;  %v5486_v6 = vld [vmem:[#allocation7 + $0xc] ss:$16 sps:$4 sm:$0xff]  }
  0x9c   :  { %1673 = vmatpush1.bf16.msra.mxu1 %v5393_v7  ;;  %1631 = vmatprep.subr.bf16.mxu0 %v5398_v8  ;;  %v5481_v7 = vld [vmem:[#allocation7 + $0x500] ss:$16 sps:$4 sm:$0xff]   ;;  %v5484_v8 = vld [vmem:[#allocation7 + $0x8] ss:$16 sps:$4 sm:$0xff]  }
  0x9d   :  { %1674 = vmatprep.subr.bf16.mxu1 %v5401_v9  ;;  %1704 = vmatprep.mubr.bf16.mxu1 %v6367_v14  ;;  %v5492_v9 = vld [vmem:[#allocation7 + $0x1ec] ss:$16 sps:$4 sm:$0xff]  }
  0x9e   :  { %1661 = vmatprep.mubr.bf16.mxu0 %v6473_v35 }
  0x9f   :  { %1632 = vmatpush1.bf16.msra.mxu0 %v5396_v10  ;;  %v5495_v10 = vld [vmem:[#allocation7 + $0x2ec] ss:$16 sps:$4 sm:$0xff]  }
  0xa0   :  { %1675 = vmatpush1.bf16.msra.mxu1 %v5399_v11  ;;  %1633 = vmatprep.subr.bf16.mxu0 %v5404_v12  ;;  %v6477_v11 = vld [vmem:[#allocation2 + $0x10] ss:$28 sps:$4 sm:$0xff]   ;;  %v5490_v12 = vld [vmem:[#allocation7 + $0x1e8] ss:$16 sps:$4 sm:$0xff]  }
  0xa1   :  { %1676 = vmatprep.subr.bf16.mxu1 %v5407_v13  ;;  %v5493_v13 = vld [vmem:[#allocation7 + $0x2e8] ss:$16 sps:$4 sm:$0xff]  }
  0xa3   :  { %1634 = vmatpush1.bf16.msra.mxu0 %v5402_v15  ;;  %v5498_v15 = vld [vmem:[#allocation7 + $0x1cc] ss:$16 sps:$4 sm:$0xff]  }
  0xa4   :  { %1677 = vmatpush1.bf16.msra.mxu1 %v5405_v16  ;;  %1635 = vmatprep.subr.bf16.mxu0 %v5410_v17  ;;  %v5501_v16 = vld [vmem:[#allocation7 + $0x2cc] ss:$16 sps:$4 sm:$0xff]   ;;  %v5496_v17 = vld [vmem:[#allocation7 + $0x1c8] ss:$16 sps:$4 sm:$0xff]  }
  0xa5   :  { %1678 = vmatprep.subr.bf16.mxu1 %v5413_v18  ;;  %v5499_v18 = vld [vmem:[#allocation7 + $0x2c8] ss:$16 sps:$4 sm:$0xff]  }
  0xa7   :  { %1636 = vmatpush1.bf16.msra.mxu0 %v5408_v19  ;;  %v5504_v19 = vld [vmem:[#allocation7 + $0x1ac] ss:$16 sps:$4 sm:$0xff]  }
  0xa8   :  { %1679 = vmatpush1.bf16.msra.mxu1 %v5411_v20  ;;  %1637 = vmatprep.subr.bf16.mxu0 %v5416_v21  ;;  %v5507_v20 = vld [vmem:[#allocation7 + $0x2ac] ss:$16 sps:$4 sm:$0xff]   ;;  %v5502_v21 = vld [vmem:[#allocation7 + $0x1a8] ss:$16 sps:$4 sm:$0xff]  }
  0xa9   :  { %1680 = vmatprep.subr.bf16.mxu1 %v5419_v22  ;;  %v5505_v22 = vld [vmem:[#allocation7 + $0x2a8] ss:$16 sps:$4 sm:$0xff]  }
  0xab   :  { %1638 = vmatpush1.bf16.msra.mxu0 %v5414_v23  ;;  %v5510_v23 = vld [vmem:[#allocation7 + $0x18c] ss:$16 sps:$4 sm:$0xff]  }
  0xac   :  { %1681 = vmatpush1.bf16.msra.mxu1 %v5417_v24  ;;  %1639 = vmatprep.subr.bf16.mxu0 %v5422_v25  ;;  %v5513_v24 = vld [vmem:[#allocation7 + $0x28c] ss:$16 sps:$4 sm:$0xff]   ;;  %v5508_v25 = vld [vmem:[#allocation7 + $0x188] ss:$16 sps:$4 sm:$0xff]  }
  0xad   :  { %1682 = vmatprep.subr.bf16.mxu1 %v5425_v26  ;;  %v5511_v26 = vld [vmem:[#allocation7 + $0x288] ss:$16 sps:$4 sm:$0xff]  }
  0xaf   :  { %1640 = vmatpush1.bf16.msra.mxu0 %v5420_v27  ;;  %v5516_v27 = vld [vmem:[#allocation7 + $0x16c] ss:$16 sps:$4 sm:$0xff]  }
  0xb0   :  { %1683 = vmatpush1.bf16.msra.mxu1 %v5423_v28  ;;  %1641 = vmatprep.subr.bf16.mxu0 %v5428_v29  ;;  %v5519_v28 = vld [vmem:[#allocation7 + $0x26c] ss:$16 sps:$4 sm:$0xff]   ;;  %v5514_v29 = vld [vmem:[#allocation7 + $0x168] ss:$16 sps:$4 sm:$0xff]  }
  0xb1   :  { %1684 = vmatprep.subr.bf16.mxu1 %v5431_v30  ;;  %v5522_v30 = vld [vmem:[#allocation7 + $0x14c] ss:$16 sps:$4 sm:$0xff]  }
  0xb3   :  { %1642 = vmatpush1.bf16.msra.mxu0 %v5426_v31  ;;  %v5525_v31 = vld [vmem:[#allocation7 + $0x24c] ss:$16 sps:$4 sm:$0xff]  }
  0xb4   :  { %1685 = vmatpush1.bf16.msra.mxu1 %v5429_v32  ;;  %1643 = vmatprep.subr.bf16.mxu0 %v5434_v33  ;;  %v5520_v32 = vld [vmem:[#allocation7 + $0x148] ss:$16 sps:$4 sm:$0xff]  }
  0xb5   :  { %1686 = vmatprep.subr.bf16.mxu1 %v5437_v34  ;;  %v5523_v33 = vld [vmem:[#allocation7 + $0x248] ss:$16 sps:$4 sm:$0xff]   ;;  %v5528_v34 = vld [vmem:[#allocation7 + $0x12c] ss:$16 sps:$4 sm:$0xff]  }
  0xb7   :  { %1644 = vmatpush1.bf16.msra.mxu0 %v5432_v36  ;;  %v5531_v36 = vld [vmem:[#allocation7 + $0x22c] ss:$16 sps:$4 sm:$0xff]  }
  0xb8   :  { %1687 = vmatpush1.bf16.msra.mxu1 %v5435_v37  ;;  %1645 = vmatprep.subr.bf16.mxu0 %v5440_v38  ;;  %v5526_v37 = vld [vmem:[#allocation7 + $0x128] ss:$16 sps:$4 sm:$0xff]  }
  0xb9   :  { %1715 = vmatprep.subr.bf16.mxu1 %v5444_v39  ;;  %v5529_v38 = vld [vmem:[#allocation7 + $0x228] ss:$16 sps:$4 sm:$0xff]   ;;  %v5534_v39 = vld [vmem:[#allocation7 + $0x10c] ss:$16 sps:$4 sm:$0xff]  }
  0xbb   :  { %1705 = vmatmul.mubr.bf16.vlgmr.msra.gmra.mxu1 %v5441_v41  ;;  %1646 = vmatpush2.bf16.msra.mxu0 %v5438_v40  ;;  %v5537_v40 = vld [vmem:[#allocation7 + $0x20c] ss:$16 sps:$4 sm:$0xff]   ;;  %v5532_v41 = vld [vmem:[#allocation7 + $0x108] ss:$16 sps:$4 sm:$0xff]  }
  0xbc   :  { %1716 = vmatpush1.bf16.msra.mxu1 %v5442_v42  ;;  %1647 = vmatprep.subr.bf16.mxu0 %v5447_v43  ;;  %v5535_v42 = vld [vmem:[#allocation7 + $0x208] ss:$16 sps:$4 sm:$0xff]   ;;  %v5540_v43 = vld [vmem:[#allocation7 + $0x3ec] ss:$16 sps:$4 sm:$0xff]  }
  0xbd   :  { %1717 = vmatprep.subr.bf16.mxu1 %v5450_v44  ;;  %1747 = vmatprep.mubr.bf16.mxu1 %v6463_v49  ;;  %v5466_v49 = vld [vmem:[#allocation7 + $0x68] ss:$16 sps:$4 sm:$0xff]   ;;  %v5543_v44 = vld [vmem:[#allocation7 + $0x4ec] ss:$16 sps:$4 sm:$0xff]  }
  0xbf   :  { %1648 = vmatpush2.bf16.msra.mxu0 %v5445_v45  ;;  %v5538_v45 = vld [vmem:[#allocation7 + $0x3e8] ss:$16 sps:$4 sm:$0xff]  }
  0xc0   :  { %1718 = vmatpush1.bf16.msra.mxu1 %v5448_v46  ;;  %1649 = vmatprep.subr.bf16.mxu0 %v5453_v47  ;;  %v5541_v46 = vld [vmem:[#allocation7 + $0x4e8] ss:$16 sps:$4 sm:$0xff]   ;;  %v5546_v47 = vld [vmem:[#allocation7 + $0x3cc] ss:$16 sps:$4 sm:$0xff]  }
  0xc1   :  { %1719 = vmatprep.subr.bf16.mxu1 %v5456_v48  ;;  %v5549_v48 = vld [vmem:[#allocation7 + $0x4cc] ss:$16 sps:$4 sm:$0xff]  }
  0xc3   :  { %1650 = vmatpush2.bf16.msra.mxu0 %v5451_v50  ;;  %v5544_v50 = vld [vmem:[#allocation7 + $0x3c8] ss:$16 sps:$4 sm:$0xff]  }
  0xc4   :  { %1720 = vmatpush1.bf16.msra.mxu1 %v5454_v52  ;;  %1651 = vmatprep.subr.bf16.mxu0 %v5459_v53  ;;  %v5547_v52 = vld [vmem:[#allocation7 + $0x4c8] ss:$16 sps:$4 sm:$0xff]   ;;  %v5552_v53 = vld [vmem:[#allocation7 + $0x3ac] ss:$16 sps:$4 sm:$0xff]  }
  0xc5   :  { %1721 = vmatprep.subr.bf16.mxu1 %v5462_v54  ;;  %v5555_v54 = vld [vmem:[#allocation7 + $0x4ac] ss:$16 sps:$4 sm:$0xff]  }
  0xc7   :  { %1652 = vmatpush2.bf16.msra.mxu0 %v5457_v55  ;;  %v5550_v55 = vld [vmem:[#allocation7 + $0x3a8] ss:$16 sps:$4 sm:$0xff]  }
  0xc8   :  { %1722 = vmatpush1.bf16.msra.mxu1 %v5460_v56  ;;  %1653 = vmatprep.subr.bf16.mxu0 %v5465_v57  ;;  %v5553_v56 = vld [vmem:[#allocation7 + $0x4a8] ss:$16 sps:$4 sm:$0xff]   ;;  %v5558_v57 = vld [vmem:[#allocation7 + $0x38c] ss:$16 sps:$4 sm:$0xff]  }
  0xc9   :  { %1723 = vmatprep.subr.bf16.mxu1 %v5468_v58  ;;  %v5561_v58 = vld [vmem:[#allocation7 + $0x48c] ss:$16 sps:$4 sm:$0xff]  }
  0xcb   :  { %1654 = vmatpush2.bf16.msra.mxu0 %v5463_v59  ;;  %v5556_v59 = vld [vmem:[#allocation7 + $0x388] ss:$16 sps:$4 sm:$0xff]  }
  0xcc   :  { %1724 = vmatpush1.bf16.msra.mxu1 %v5466_v49  ;;  %1655 = vmatprep.subr.bf16.mxu0 %v5471_v60  ;;  %v5564_v49 = vld [vmem:[#allocation7 + $0x36c] ss:$16 sps:$4 sm:$0xff]  }
  0xcd   :  { %1725 = vmatprep.subr.bf16.mxu1 %v5474_v61  ;;  %v5567_v60 = vld [vmem:[#allocation7 + $0x46c] ss:$16 sps:$4 sm:$0xff]   ;;  %v5562_v61 = vld [vmem:[#allocation7 + $0x368] ss:$16 sps:$4 sm:$0xff]  }
  0xcf   :  { %1656 = vmatpush2.bf16.msra.mxu0 %v5469_v62  ;;  %v5565_v62 = vld [vmem:[#allocation7 + $0x468] ss:$16 sps:$4 sm:$0xff]  }
  0xd0   :  { %1726 = vmatpush1.bf16.msra.mxu1 %v5472_v63  ;;  %1657 = vmatprep.subr.bf16.mxu0 %v5477_v0  ;;  %v5570_v63 = vld [vmem:[#allocation7 + $0x34c] ss:$16 sps:$4 sm:$0xff]  }
  0xd1   :  { %1727 = vmatprep.subr.bf16.mxu1 %v5480_v1  ;;  %v5573_v0 = vld [vmem:[#allocation7 + $0x44c] ss:$16 sps:$4 sm:$0xff]   ;;  %v5571_v1 = vld [vmem:[#allocation7 + $0x448] ss:$16 sps:$4 sm:$0xff]  }
  0xd3   :  { %1658 = vmatpush2.bf16.msra.mxu0 %v5475_v2  ;;  %v5576_v2 = vld [vmem:[#allocation7 + $0x32c] ss:$16 sps:$4 sm:$0xff]  }
  0xd4   :  { %1728 = vmatpush1.bf16.msra.mxu1 %v5478_v3  ;;  %1659 = vmatprep.subr.bf16.mxu0 %v5483_v5  ;;  %v5579_v3 = vld [vmem:[#allocation7 + $0x42c] ss:$16 sps:$4 sm:$0xff]   ;;  %v5574_v5 = vld [vmem:[#allocation7 + $0x328] ss:$16 sps:$4 sm:$0xff]  }
  0xd5   :  { %1729 = vmatprep.subr.bf16.mxu1 %v5486_v6  ;;  %v5577_v6 = vld [vmem:[#allocation7 + $0x428] ss:$16 sps:$4 sm:$0xff]  }
  0xd7   :  { %1660 = vmatpush2.bf16.msra.mxu0 %v5481_v7  ;;  %v5582_v7 = vld [vmem:[#allocation7 + $0x30c] ss:$16 sps:$4 sm:$0xff]  }
  0xd8   :  { %1730 = vmatpush1.bf16.msra.mxu1 %v5484_v8  ;;  %1758 = vmatprep.subr.bf16.mxu0 %v5495_v10  ;;  %v5585_v8 = vld [vmem:[#allocation7 + $0x40c] ss:$16 sps:$4 sm:$0xff]   ;;  %v5583_v10 = vld [vmem:[#allocation7 + $0x408] ss:$16 sps:$4 sm:$0xff]  }
  0xd9   :  { %1731 = vmatprep.subr.bf16.mxu1 %v5492_v9  ;;  %v5580_v9 = vld [vmem:[#allocation7 + $0x308] ss:$16 sps:$4 sm:$0xff]  }
  0xda   :  { %1662 = vmatmul.mubr.bf16.vlgmr.msra.gmra.mxu0 %v6477_v11 }
  0xdb   :  { %1759 = vmatpush1.bf16.msra.mxu0 %v5493_v13  ;;  %1790 = vmatprep.mubr.bf16.mxu0 %v6465_v51  ;;  %v5517_v51 = vld [vmem:[#allocation7 + $0x268] ss:$16 sps:$4 sm:$0xff]   ;;  %v5591_v13 = vld [vmem:[#allocation7 + $0x6ec] ss:$16 sps:$4 sm:$0xff]  }
  0xdc   :  { %1732 = vmatpush2.bf16.msra.mxu1 %v5490_v12  ;;  %1760 = vmatprep.subr.bf16.mxu0 %v5501_v16  ;;  %v5588_v12 = vld [vmem:[#allocation7 + $0x5ec] ss:$16 sps:$4 sm:$0xff]   ;;  %v5589_v16 = vld [vmem:[#allocation7 + $0x6e8] ss:$16 sps:$4 sm:$0xff]  }
  0xdd   :  { %1733 = vmatprep.subr.bf16.mxu1 %v5498_v15  ;;  %v5586_v15 = vld [vmem:[#allocation7 + $0x5e8] ss:$16 sps:$4 sm:$0xff]  }
  0xdf   :  { %1761 = vmatpush1.bf16.msra.mxu0 %v5499_v18  ;;  %v5597_v18 = vld [vmem:[#allocation7 + $0x6cc] ss:$16 sps:$4 sm:$0xff]  }
  0xe0   :  { %1734 = vmatpush2.bf16.msra.mxu1 %v5496_v17  ;;  %1762 = vmatprep.subr.bf16.mxu0 %v5507_v20  ;;  %v5594_v17 = vld [vmem:[#allocation7 + $0x5cc] ss:$16 sps:$4 sm:$0xff]   ;;  %v5595_v20 = vld [vmem:[#allocation7 + $0x6c8] ss:$16 sps:$4 sm:$0xff]  }
  0xe1   :  { %1735 = vmatprep.subr.bf16.mxu1 %v5504_v19  ;;  %v5592_v19 = vld [vmem:[#allocation7 + $0x5c8] ss:$16 sps:$4 sm:$0xff]  }
  0xe3   :  { %1763 = vmatpush1.bf16.msra.mxu0 %v5505_v22  ;;  %v5600_v22 = vld [vmem:[#allocation7 + $0x5ac] ss:$16 sps:$4 sm:$0xff]  }
  0xe4   :  { %1736 = vmatpush2.bf16.msra.mxu1 %v5502_v21  ;;  %1764 = vmatprep.subr.bf16.mxu0 %v5513_v24  ;;  %v6158_v21 = vld [vmem:[#allocation2 + $0x8] ss:$28 sps:$4 sm:$0xff]  }
  0xe5   :  { %1737 = vmatprep.subr.bf16.mxu1 %v5510_v23  ;;  %v5603_v23 = vld [vmem:[#allocation7 + $0x6ac] ss:$16 sps:$4 sm:$0xff]   ;;  %v5598_v24 = vld [vmem:[#allocation7 + $0x5a8] ss:$16 sps:$4 sm:$0xff]  }
  0xe7   :  { %1765 = vmatpush1.bf16.msra.mxu0 %v5511_v26  ;;  %v5606_v26 = vld [vmem:[#allocation7 + $0x58c] ss:$16 sps:$4 sm:$0xff]  }
  0xe8   :  { %1738 = vmatpush2.bf16.msra.mxu1 %v5508_v25  ;;  %1766 = vmatprep.subr.bf16.mxu0 %v5519_v28  ;;  %v5601_v25 = vld [vmem:[#allocation7 + $0x6a8] ss:$16 sps:$4 sm:$0xff]  }
  0xe9   :  { %1739 = vmatprep.subr.bf16.mxu1 %v5516_v27  ;;  %v5609_v27 = vld [vmem:[#allocation7 + $0x68c] ss:$16 sps:$4 sm:$0xff]   ;;  %v5604_v28 = vld [vmem:[#allocation7 + $0x588] ss:$16 sps:$4 sm:$0xff]  }
  0xeb   :  { %1767 = vmatpush1.bf16.msra.mxu0 %v5517_v51  ;;  %v5612_v51 = vld [vmem:[#allocation7 + $0x56c] ss:$16 sps:$4 sm:$0xff]  }
  0xec   :  { %1740 = vmatpush2.bf16.msra.mxu1 %v5514_v29  ;;  %1768 = vmatprep.subr.bf16.mxu0 %v5525_v31  ;;  %v5607_v29 = vld [vmem:[#allocation7 + $0x688] ss:$16 sps:$4 sm:$0xff]  }
  0xed   :  { %1741 = vmatprep.subr.bf16.mxu1 %v5522_v30  ;;  %v5615_v30 = vld [vmem:[#allocation7 + $0x66c] ss:$16 sps:$4 sm:$0xff]   ;;  %v5610_v31 = vld [vmem:[#allocation7 + $0x568] ss:$16 sps:$4 sm:$0xff]  }
  0xef   :  { %1769 = vmatpush1.bf16.msra.mxu0 %v5523_v33  ;;  %v5618_v33 = vld [vmem:[#allocation7 + $0x54c] ss:$16 sps:$4 sm:$0xff]  }
  0xf0   :  { %1742 = vmatpush2.bf16.msra.mxu1 %v5520_v32  ;;  %1770 = vmatprep.subr.bf16.mxu0 %v5531_v36  ;;  %v5613_v32 = vld [vmem:[#allocation7 + $0x668] ss:$16 sps:$4 sm:$0xff]  }
  0xf1   :  { %1743 = vmatprep.subr.bf16.mxu1 %v5528_v34  ;;  %v5621_v34 = vld [vmem:[#allocation7 + $0x64c] ss:$16 sps:$4 sm:$0xff]   ;;  %v5616_v36 = vld [vmem:[#allocation7 + $0x548] ss:$16 sps:$4 sm:$0xff]  }
  0xf3   :  { %1771 = vmatpush1.bf16.msra.mxu0 %v5529_v38  ;;  %v5624_v38 = vld [vmem:[#allocation7 + $0x52c] ss:$16 sps:$4 sm:$0xff]  }
  0xf4   :  { %1744 = vmatpush2.bf16.msra.mxu1 %v5526_v37  ;;  %1772 = vmatprep.subr.bf16.mxu0 %v5537_v40  ;;  %v5619_v37 = vld [vmem:[#allocation7 + $0x648] ss:$16 sps:$4 sm:$0xff]  }
  0xf5   :  { %1745 = vmatprep.subr.bf16.mxu1 %v5534_v39  ;;  %v5627_v39 = vld [vmem:[#allocation7 + $0x62c] ss:$16 sps:$4 sm:$0xff]   ;;  %v5622_v40 = vld [vmem:[#allocation7 + $0x528] ss:$16 sps:$4 sm:$0xff]  }
  0xf7   :  { %1773 = vmatpush1.bf16.msra.mxu0 %v5535_v42  ;;  %v5630_v42 = vld [vmem:[#allocation7 + $0x50c] ss:$16 sps:$4 sm:$0xff]  }
  0xf8   :  { %1746 = vmatpush2.bf16.msra.mxu1 %v5532_v41  ;;  %1774 = vmatprep.subr.bf16.mxu0 %v5540_v43  ;;  %v5625_v41 = vld [vmem:[#allocation7 + $0x628] ss:$16 sps:$4 sm:$0xff]   ;;  %v5633_v43 = vld [vmem:[#allocation7 + $0x60c] ss:$16 sps:$4 sm:$0xff]  }
  0xf9   :  { %1801 = vmatprep.subr.bf16.mxu1 %v5543_v44  ;;  %v5628_v44 = vld [vmem:[#allocation7 + $0x508] ss:$16 sps:$4 sm:$0xff]  }
  0xfb   :  { %1748 = vmatmul.mubr.bf16.vlgmr.msra.gmra.mxu1 %v6469_v4  ;;  %1775 = vmatpush2.bf16.msra.mxu0 %v5538_v45  ;;  %v5559_v4 = vld [vmem:[#allocation7 + $0x488] ss:$16 sps:$4 sm:$0xff]  }
  0xfc   :  { %1802 = vmatpush1.bf16.msra.mxu1 %v5541_v46  ;;  %1776 = vmatprep.subr.bf16.mxu0 %v5546_v47  ;;  %v5631_v45 = vld [vmem:[#allocation7 + $0x608] ss:$16 sps:$4 sm:$0xff]   ;;  %v5636_v46 = vld [vmem:[#allocation8 + $0x74] ss:$8 sps:$4 sm:$0xff]  }
  0xfd   :  { %1803 = vmatprep.subr.bf16.mxu1 %v5549_v48  ;;  %1833 = vmatprep.mubr.bf16.mxu1 %v6473_v35  ;;  %v5568_v35 = vld [vmem:[#allocation7 + $0x348] ss:$16 sps:$4 sm:$0xff]   ;;  %v5639_v48 = vld [vmem:[#allocation8 + $0x64] ss:$8 sps:$4 sm:$0xff]  }
  0xfe   :  { %v5634_v47 = vld [vmem:[#allocation8 + $0x70] ss:$8 sps:$4 sm:$0xff]  }
  0xff   :  { %1777 = vmatpush2.bf16.msra.mxu0 %v5544_v50  ;;  %v5637_v50 = vld [vmem:[#allocation8 + $0x60] ss:$8 sps:$4 sm:$0xff]  }
 0x100   :  { %1804 = vmatpush1.bf16.msra.mxu1 %v5547_v52  ;;  %1778 = vmatprep.subr.bf16.mxu0 %v5552_v53  ;;  %v6159_v52 = vld [vmem:[#allocation2 + $0x18] ss:$28 sps:$4 sm:$0xff]  }
 0x101   :  { %1805 = vmatprep.subr.bf16.mxu1 %v5555_v54  ;;  %v5642_v53 = vld [vmem:[#allocation8 + $0x54] ss:$8 sps:$4 sm:$0xff]   ;;  %v5640_v54 = vld [vmem:[#allocation8 + $0x50] ss:$8 sps:$4 sm:$0xff]  }
 0x103   :  { %1779 = vmatpush2.bf16.msra.mxu0 %v5550_v55  ;;  %v5645_v55 = vld [vmem:[#allocation8 + $0x44] ss:$8 sps:$4 sm:$0xff]  }
 0x104   :  { %1806 = vmatpush1.bf16.msra.mxu1 %v5553_v56  ;;  %1780 = vmatprep.subr.bf16.mxu0 %v5558_v57  ;;  %v5682_v56 = vld [vmem:[#allocation8 + $0x170] ss:$8 sps:$4 sm:$0xff]   ;;  %v5684_v57 = vld [vmem:[#allocation8 + $0x174] ss:$8 sps:$4 sm:$0xff]  }
 0x105   :  { %1807 = vmatprep.subr.bf16.mxu1 %v5561_v58  ;;  %v5643_v58 = vld [vmem:[#allocation8 + $0x40] ss:$8 sps:$4 sm:$0xff]  }
 0x107   :  { %1781 = vmatpush2.bf16.msra.mxu0 %v5556_v59  ;;  %v5648_v59 = vld [vmem:[#allocation8 + $0x34] ss:$8 sps:$4 sm:$0xff]  }
 0x108   :  { %1808 = vmatpush1.bf16.msra.mxu1 %v5559_v4  ;;  %1782 = vmatprep.subr.bf16.mxu0 %v5564_v49  ;;  %v5687_v4 = vld [vmem:[#allocation8 + $0x164] ss:$8 sps:$4 sm:$0xff]   ;;  %v5685_v49 = vld [vmem:[#allocation8 + $0x160] ss:$8 sps:$4 sm:$0xff]  }
 0x109   :  { %1809 = vmatprep.subr.bf16.mxu1 %v5567_v60  ;;  %v5690_v60 = vld [vmem:[#allocation8 + $0x154] ss:$8 sps:$4 sm:$0xff]  }
 0x10b   :  { %1783 = vmatpush2.bf16.msra.mxu0 %v5562_v61  ;;  %v5651_v61 = vld [vmem:[#allocation8 + $0x24] ss:$8 sps:$4 sm:$0xff]  }
 0x10c   :  { %1810 = vmatpush1.bf16.msra.mxu1 %v5565_v62  ;;  %1784 = vmatprep.subr.bf16.mxu0 %v5570_v63  ;;  %v5688_v62 = vld [vmem:[#allocation8 + $0x150] ss:$8 sps:$4 sm:$0xff]   ;;  %v5693_v63 = vld [vmem:[#allocation8 + $0x144] ss:$8 sps:$4 sm:$0xff]  }
 0x10d   :  { %1811 = vmatprep.subr.bf16.mxu1 %v5573_v0  ;;  %v5649_v0 = vld [vmem:[#allocation8 + $0x20] ss:$8 sps:$4 sm:$0xff]  }
 0x10f   :  { %1785 = vmatpush2.bf16.msra.mxu0 %v5568_v35  ;;  %v5654_v35 = vld [vmem:[#allocation8 + $0x14] ss:$8 sps:$4 sm:$0xff]  }
 0x110   :  { %1812 = vmatpush1.bf16.msra.mxu1 %v5571_v1  ;;  %1786 = vmatprep.subr.bf16.mxu0 %v5576_v2  ;;  %v5691_v1 = vld [vmem:[#allocation8 + $0x140] ss:$8 sps:$4 sm:$0xff]   ;;  %v5652_v2 = vld [vmem:[#allocation8 + $0x10] ss:$8 sps:$4 sm:$0xff]  }
 0x111   :  { %1813 = vmatprep.subr.bf16.mxu1 %v5579_v3  ;;  %v5657_v3 = vld [vmem:[#allocation8 + $0x4] ss:$8 sps:$4 sm:$0xff]  }
 0x113   :  { %1787 = vmatpush2.bf16.msra.mxu0 %v5574_v5  ;;  %v5655_v5 = vld [vmem:[#allocation8] ss:$8 sps:$4 sm:$0xff]  }
 0x114   :  { %1814 = vmatpush1.bf16.msra.mxu1 %v5577_v6  ;;  %1788 = vmatprep.subr.bf16.mxu0 %v5582_v7  ;;  %v5660_v6 = vld [vmem:[#allocation8 + $0xf4] ss:$8 sps:$4 sm:$0xff]   ;;  %v5658_v7 = vld [vmem:[#allocation8 + $0xf0] ss:$8 sps:$4 sm:$0xff]  }
 0x115   :  { %1815 = vmatprep.subr.bf16.mxu1 %v5585_v8  ;;  %v5663_v8 = vld [vmem:[#allocation8 + $0xe4] ss:$8 sps:$4 sm:$0xff]  }
 0x117   :  { %1789 = vmatpush2.bf16.msra.mxu0 %v5580_v9  ;;  %v5696_v9 = vld [vmem:[#allocation8 + $0x134] ss:$8 sps:$4 sm:$0xff]  }
 0x118   :  { %1816 = vmatpush1.bf16.msra.mxu1 %v5583_v10  ;;  %1844 = vmatprep.subr.bf16.mxu0 %v5591_v13  ;;  %v5661_v10 = vld [vmem:[#allocation8 + $0xe0] ss:$8 sps:$4 sm:$0xff]   ;;  %v5666_v13 = vld [vmem:[#allocation8 + $0xd4] ss:$8 sps:$4 sm:$0xff]  }
 0x119   :  { %1817 = vmatprep.subr.bf16.mxu1 %v5588_v12  ;;  %v5694_v12 = vld [vmem:[#allocation8 + $0x130] ss:$8 sps:$4 sm:$0xff]  }
 0x11a   :  { %1791 = vmatmul.mubr.bf16.vlgmr.msra.gmra.mxu0 %v6158_v21  ;;  %v5705_v21 = vld [vmem:[#allocation8 + $0x104] ss:$8 sps:$4 sm:$0xff]  }
 0x11b   :  { %1845 = vmatpush1.bf16.msra.mxu0 %v5589_v16  ;;  %1876 = vmatprep.mubr.bf16.mxu0 %v6367_v14  ;;  %v5664_v16 = vld [vmem:[#allocation8 + $0xd0] ss:$8 sps:$4 sm:$0xff]  }
 0x11c   :  { %1818 = vmatpush2.bf16.msra.mxu1 %v5586_v15  ;;  %1846 = vmatprep.subr.bf16.mxu0 %v5597_v18  ;;  %v5699_v15 = vld [vmem:[#allocation8 + $0x124] ss:$8 sps:$4 sm:$0xff]  }
 0x11d   :  { %1819 = vmatprep.subr.bf16.mxu1 %v5594_v17  ;;  %v5697_v17 = vld [vmem:[#allocation8 + $0x120] ss:$8 sps:$4 sm:$0xff]   ;;  %v5669_v18 = vld [vmem:[#allocation8 + $0xc4] ss:$8 sps:$4 sm:$0xff]  }
 0x11f   :  { %1847 = vmatpush1.bf16.msra.mxu0 %v5595_v20  ;;  %v5700_v20 = vld [vmem:[#allocation8 + $0x110] ss:$8 sps:$4 sm:$0xff]  }
 0x120   :  { %1820 = vmatpush2.bf16.msra.mxu1 %v5592_v19  ;;  %1848 = vmatprep.subr.bf16.mxu0 %v5603_v23  ;;  %v5702_v19 = vld [vmem:[#allocation8 + $0x114] ss:$8 sps:$4 sm:$0xff]   ;;  %v5703_v23 = vld [vmem:[#allocation8 + $0x100] ss:$8 sps:$4 sm:$0xff]  }
 0x121   :  { %1821 = vmatprep.subr.bf16.mxu1 %v5600_v22  ;;  %v5667_v22 = vld [vmem:[#allocation8 + $0xc0] ss:$8 sps:$4 sm:$0xff]  }
 0x123   :  { %1849 = vmatpush1.bf16.msra.mxu0 %v5601_v25  ;;  %v5708_v25 = vld [vmem:[#allocation8 + $0x1f4] ss:$8 sps:$4 sm:$0xff]  }
 0x124   :  { %1822 = vmatpush2.bf16.msra.mxu1 %v5598_v24  ;;  %1850 = vmatprep.subr.bf16.mxu0 %v5609_v27  ;;  %v5672_v24 = vld [vmem:[#allocation8 + $0xb4] ss:$8 sps:$4 sm:$0xff]   ;;  %v5706_v27 = vld [vmem:[#allocation8 + $0x1f0] ss:$8 sps:$4 sm:$0xff]  }
 0x125   :  { %1823 = vmatprep.subr.bf16.mxu1 %v5606_v26  ;;  %v5670_v26 = vld [vmem:[#allocation8 + $0xb0] ss:$8 sps:$4 sm:$0xff]  }
 0x127   :  { %1851 = vmatpush1.bf16.msra.mxu0 %v5607_v29  ;;  %v5711_v29 = vld [vmem:[#allocation8 + $0x1e4] ss:$8 sps:$4 sm:$0xff]  }
 0x128   :  { %1824 = vmatpush2.bf16.msra.mxu1 %v5604_v28  ;;  %1852 = vmatprep.subr.bf16.mxu0 %v5615_v30  ;;  %v5675_v28 = vld [vmem:[#allocation8 + $0xa4] ss:$8 sps:$4 sm:$0xff]   ;;  %v5709_v30 = vld [vmem:[#allocation8 + $0x1e0] ss:$8 sps:$4 sm:$0xff]  }
 0x129   :  { %1825 = vmatprep.subr.bf16.mxu1 %v5612_v51  ;;  %v5673_v51 = vld [vmem:[#allocation8 + $0xa0] ss:$8 sps:$4 sm:$0xff]  }
 0x12b   :  { %1853 = vmatpush1.bf16.msra.mxu0 %v5613_v32  ;;  %v5714_v32 = vld [vmem:[#allocation8 + $0x1d4] ss:$8 sps:$4 sm:$0xff]  }
 0x12c   :  { %1826 = vmatpush2.bf16.msra.mxu1 %v5610_v31  ;;  %1854 = vmatprep.subr.bf16.mxu0 %v5621_v34  ;;  %v5678_v31 = vld [vmem:[#allocation8 + $0x94] ss:$8 sps:$4 sm:$0xff]   ;;  %v5712_v34 = vld [vmem:[#allocation8 + $0x1d0] ss:$8 sps:$4 sm:$0xff]  }
 0x12d   :  { %1827 = vmatprep.subr.bf16.mxu1 %v5618_v33  ;;  %v5676_v33 = vld [vmem:[#allocation8 + $0x90] ss:$8 sps:$4 sm:$0xff]  }
 0x12f   :  { %1855 = vmatpush1.bf16.msra.mxu0 %v5619_v37  ;;  %v5717_v37 = vld [vmem:[#allocation8 + $0x1c4] ss:$8 sps:$4 sm:$0xff]  }
 0x130   :  { %1828 = vmatpush2.bf16.msra.mxu1 %v5616_v36  ;;  %1856 = vmatprep.subr.bf16.mxu0 %v5627_v39  ;;  %v5681_v36 = vld [vmem:[#allocation8 + $0x84] ss:$8 sps:$4 sm:$0xff]   ;;  %v5715_v39 = vld [vmem:[#allocation8 + $0x1c0] ss:$8 sps:$4 sm:$0xff]  }
 0x131   :  { %1829 = vmatprep.subr.bf16.mxu1 %v5624_v38  ;;  %v5679_v38 = vld [vmem:[#allocation8 + $0x80] ss:$8 sps:$4 sm:$0xff]  }
 0x133   :  { %1857 = vmatpush1.bf16.msra.mxu0 %v5625_v41  ;;  %v5718_v41 = vld [vmem:[#allocation8 + $0x1b0] ss:$8 sps:$4 sm:$0xff]  }
 0x134   :  { %1830 = vmatpush2.bf16.msra.mxu1 %v5622_v40  ;;  %1858 = vmatprep.subr.bf16.mxu0 %v5633_v43  ;;  %v5720_v40 = vld [vmem:[#allocation8 + $0x1b4] ss:$8 sps:$4 sm:$0xff]   ;;  %v5721_v43 = vld [vmem:[#allocation8 + $0x1a0] ss:$8 sps:$4 sm:$0xff]  }
 0x135   :  { %1831 = vmatprep.subr.bf16.mxu1 %v5630_v42  ;;  %v5723_v42 = vld [vmem:[#allocation8 + $0x1a4] ss:$8 sps:$4 sm:$0xff]  }
 0x137   :  { %1859 = vmatpush1.bf16.msra.mxu0 %v5631_v45  ;;  %v5724_v45 = vld [vmem:[#allocation8 + $0x190] ss:$8 sps:$4 sm:$0xff]  }
 0x138   :  { %1832 = vmatpush2.bf16.msra.mxu1 %v5628_v44  ;;  %2295 = vmatprep.subr.bf16.mxu0 %v5636_v46  ;;  %v5726_v44 = vld [vmem:[#allocation8 + $0x194] ss:$8 sps:$4 sm:$0xff]   ;;  %v5729_v46 = vld [vmem:[#allocation8 + $0x184] ss:$8 sps:$4 sm:$0xff]  }
 0x139   :  { %2338 = vmatprep.subr.bf16.mxu1 %v5684_v57 }
 0x13a   :  { %1877 = vmatmul.mubr.bf16.vlgmr.msra.gmra.mxu0 %v6159_v52 }
 0x13b   :  { %1834 = vmatmul.mubr.bf16.vlgmr.msra.gmra.mxu1 %v6477_v11  ;;  %2296 = vmatpush1.bf16.msra.mxu0 %v5634_v47  ;;  %v5646_v11 = vld [vmem:[#allocation8 + $0x30] ss:$8 sps:$4 sm:$0xff]   ;;  %v5727_v47 = vld [vmem:[#allocation8 + $0x180] ss:$8 sps:$4 sm:$0xff]  }
 0x13c   :  { %2297 = vmatprep.subr.bf16.mxu0 %v5639_v48  ;;  %2339 = vmatpush1.bf16.msra.mxu1 %v5682_v56  ;;  %v367_v48 = vlaneseq }
 0x13d   :  { %2340 = vmatprep.subr.bf16.mxu1 %v5687_v4 }
 0x13e   :  { %v6485_v52 = vshrl.u32 %v367_v48, 7 }
 0x13f   :  { %2298 = vmatpush1.bf16.msra.mxu0 %v5637_v50 }
 0x140   :  { %2299 = vmatprep.subr.bf16.mxu0 %v5642_v53  ;;  %2341 = vmatpush1.bf16.msra.mxu1 %v5685_v49  ;;  %v6491_v56 = vsub.s32 0, %v6485_v52 }
 0x141   :  { %2342 = vmatprep.subr.bf16.mxu1 %v5690_v60 }
 0x143   :  { %2300 = vmatpush1.bf16.msra.mxu0 %v5640_v54 }
 0x144   :  { %2301 = vmatprep.subr.bf16.mxu0 %v5645_v55  ;;  %2343 = vmatpush1.bf16.msra.mxu1 %v5688_v62  ;;  %v6488_v55 = vsub.s32 1, %v6485_v52 }
 0x145   :  { %2344 = vmatprep.subr.bf16.mxu1 %v5693_v63 }
 0x147   :  { %2302 = vmatpush1.bf16.msra.mxu0 %v5643_v58 }
 0x148   :  { %2303 = vmatprep.subr.bf16.mxu0 %v5648_v59  ;;  %2345 = vmatpush1.bf16.msra.mxu1 %v5691_v1  ;;  %v365_v59 = vld [vmem:[%s6575_s3] sm:$0xf] }
 0x149   :  { %2346 = vmatprep.subr.bf16.mxu1 %v5696_v9  ;;  %v374_v4 = vrot.slane %v365_v59, %v6488_v55  ;;  %v370_v49 = vrot.slane %v365_v59, %v6491_v56 }
 0x14b   :  { %2304 = vmatpush1.bf16.msra.mxu0 %v5646_v11 }
 0x14c   :  { %2305 = vmatprep.subr.bf16.mxu0 %v5651_v61  ;;  %2347 = vmatpush1.bf16.msra.mxu1 %v5694_v12 }
 0x14d   :  { %2348 = vmatprep.subr.bf16.mxu1 %v5699_v15 }
 0x14f   :  { %2306 = vmatpush1.bf16.msra.mxu0 %v5649_v0 }
 0x150   :  { %2307 = vmatprep.subr.bf16.mxu0 %v5654_v35  ;;  %2349 = vmatpush1.bf16.msra.mxu1 %v5697_v17 }
 0x151   :  { %2350 = vmatprep.subr.bf16.mxu1 %v5702_v19 }
 0x153   :  { %2308 = vmatpush1.bf16.msra.mxu0 %v5652_v2 }
 0x154   :  { %2309 = vmatprep.subr.bf16.mxu0 %v5657_v3  ;;  %2351 = vmatpush1.bf16.msra.mxu1 %v5700_v20 }
 0x155   :  { %2352 = vmatprep.subr.bf16.mxu1 %v5705_v21 }
 0x157   :  { %2310 = vmatpush1.bf16.msra.mxu0 %v5655_v5 }
 0x158   :  { %2311 = vmatprep.subr.bf16.mxu0 %v5660_v6  ;;  %2353 = vmatpush1.bf16.msra.mxu1 %v5703_v23 }
 0x159   :  { %2354 = vmatprep.subr.bf16.mxu1 %v5708_v25 }
 0x15a   :  { %v1577_v53 = vpop.f32.mrf.mxu0 }
 0x15b   :  { %2312 = vmatpush2.bf16.msra.mxu0 %v5658_v7  ;;  %v1620_v50 = vpop.f32.mrf.mxu1  ;;  %v1578_v63 = vadd.f32 %v1577_v53, %v370_v49 }
 0x15c   :  { %2313 = vmatprep.subr.bf16.mxu0 %v5663_v8  ;;  %2355 = vmatpush2.bf16.msra.mxu1 %v5706_v27  ;;  %v1579_v57 = vpop.f32.mrf.mxu0 }
 0x15d   :  { %2356 = vmatprep.subr.bf16.mxu1 %v5711_v29  ;;  %v1622_v54 = vpop.f32.mrf.mxu1  ;;  %v1580_v62 = vadd.f32 %v1579_v57, %v374_v4  ;;  %v1621_v6 = vadd.f32 %v1620_v50, %v1578_v63 }
 0x15e   :  { %v1581_v60 = vpop.f32.mrf.mxu0 }
 0x15f   :  { %2314 = vmatpush2.bf16.msra.mxu0 %v5661_v10  ;;  %v1624_v58 = vpop.f32.mrf.mxu1  ;;  %v1582_v35 = vadd.f32 %v1581_v60, %v370_v49  ;;  %v1623_v3 = vadd.f32 %v1622_v54, %v1580_v62 }
 0x160   :  { %2315 = vmatprep.subr.bf16.mxu0 %v5666_v13  ;;  %2357 = vmatpush2.bf16.msra.mxu1 %v5709_v30  ;;  %v1583_v0 = vpop.f32.mrf.mxu0 }
 0x161   :  { %2358 = vmatprep.subr.bf16.mxu1 %v5714_v32  ;;  %v1626_v11 = vpop.f32.mrf.mxu1  ;;  %v1584_v5 = vadd.f32 %v1583_v0, %v374_v4  ;;  %v1625_v8 = vadd.f32 %v1624_v58, %v1582_v35 }
 0x163   :  { %2316 = vmatpush2.bf16.msra.mxu0 %v5664_v16  ;;  %v1627_v15 = vadd.f32 %v1626_v11, %v1584_v5 }
 0x164   :  { %2317 = vmatprep.subr.bf16.mxu0 %v5669_v18  ;;  %2359 = vmatpush2.bf16.msra.mxu1 %v5712_v34  ;;  %v6503_v34 = vsub.s32 2, %v6485_v52 }
 0x165   :  { %2360 = vmatprep.subr.bf16.mxu1 %v5717_v37 }
 0x167   :  { %2318 = vmatpush2.bf16.msra.mxu0 %v5667_v22 }
 0x168   :  { %2319 = vmatprep.subr.bf16.mxu0 %v5672_v24  ;;  %2361 = vmatpush2.bf16.msra.mxu1 %v5715_v39  ;;  %v378_v39 = vrot.slane %v365_v59, %v6503_v34 }
 0x169   :  { %2362 = vmatprep.subr.bf16.mxu1 %v5720_v40 }
 0x16b   :  { %2320 = vmatpush2.bf16.msra.mxu0 %v5670_v26 }
 0x16c   :  { %2321 = vmatprep.subr.bf16.mxu0 %v5675_v28  ;;  %2363 = vmatpush2.bf16.msra.mxu1 %v5718_v41 }
 0x16d   :  { %2364 = vmatprep.subr.bf16.mxu1 %v5723_v42 }
 0x16f   :  { %2322 = vmatpush2.bf16.msra.mxu0 %v5673_v51 }
 0x170   :  { %2323 = vmatprep.subr.bf16.mxu0 %v5678_v31  ;;  %2365 = vmatpush2.bf16.msra.mxu1 %v5721_v43 }
 0x171   :  { %2366 = vmatprep.subr.bf16.mxu1 %v5726_v44 }
 0x173   :  { %2324 = vmatpush2.bf16.msra.mxu0 %v5676_v33  ;;  %v6500_v33 = vsub.s32 3, %v6485_v52 }
 0x174   :  { %2325 = vmatprep.subr.bf16.mxu0 %v5681_v36  ;;  %2367 = vmatpush2.bf16.msra.mxu1 %v5724_v45 }
 0x175   :  { %2368 = vmatprep.subr.bf16.mxu1 %v5729_v46 }
 0x177   :  { %2326 = vmatpush2.bf16.msra.mxu0 %v5679_v38  ;;  %v382_v38 = vrot.slane %v365_v59, %v6500_v33 }
 0x178   :  { %2369 = vmatpush2.bf16.msra.mxu1 %v5727_v47 }
 0x17b   :  { %v1706_v61 = vpop.f32.mrf.mxu1 }
 0x17d   :  { %v1708_v1 = vpop.f32.mrf.mxu1 }
 0x17f   :  { %v1710_v10 = vpop.f32.mrf.mxu1 }
 0x181   :  { %v1712_v21 = vpop.f32.mrf.mxu1 }
 0x19a   :  { %v1663_v2 = vpop.f32.mrf.mxu0 }
 0x19b   :  { %v1664_v12 = vadd.f32 %v1663_v2, %v1621_v6 }
 0x19c   :  { %v1665_v7 = vpop.f32.mrf.mxu0 }
 0x19d   :  { %v1666_v9 = vadd.f32 %v1665_v7, %v1623_v3  ;;  %v1707_v22 = vadd.f32 %v1706_v61, %v1664_v12  ;;  %v5735_v12 = vld [vmem:[#allocation10 + $0xec] ss:$16 sps:$4 sm:$0xff]  }
 0x19e   :  { %v1667_v13 = vpop.f32.mrf.mxu0  ;;  %2653 = vmatprep.subr.bf16.mxu1 %v5735_v12 }
 0x19f   :  { %v1668_v16 = vadd.f32 %v1667_v13, %v1625_v8  ;;  %v1709_v18 = vadd.f32 %v1708_v1, %v1666_v9  ;;  %v1887_v27 = vmax.f32 %v1707_v22, 0.0  ;;  %v5730_v13 = vld [vmem:[#allocation10 + $0xe0] ss:$16 sps:$4 sm:$0xff]  }
 0x1a0   :  { %v1669_v17 = vpop.f32.mrf.mxu0  ;;  %v5742_v22 = vld [vmem:[#allocation10 + $0xa0] ss:$16 sps:$4 sm:$0xff]  }
 0x1a1   :  { %v1711_v19 = vadd.f32 %v1710_v10, %v1668_v16  ;;  %v1670_v20 = vadd.f32 %v1669_v17, %v1627_v15  ;;  %v1888_v25 = vmax.f32 %v1709_v18, 0.0  ;;  %v5732_v10 = vld [vmem:[#allocation10 + $0xe4] ss:$16 sps:$4 sm:$0xff]   ;;  %v5733_v15 = vld [vmem:[#allocation10 + $0xe8] ss:$16 sps:$4 sm:$0xff]  }
 0x1a2   :  { %2610 = vmatprep.subr.bf16.mxu0 %v5732_v10  ;;  %v5738_v16 = vld [vmem:[#allocation10 + $0xc4] ss:$16 sps:$4 sm:$0xff]   ;;  %v5741_v17 = vld [vmem:[#allocation10 + $0xcc] ss:$16 sps:$4 sm:$0xff]   ;;  %v5736_v18 = vld [vmem:[#allocation10 + $0xc0] ss:$16 sps:$4 sm:$0xff]  }
 0x1a3   :  { %v1713_v23 = vadd.f32 %v1712_v21, %v1670_v20  ;;  %v1891_v24 = vmax.f32 %v1711_v19, 0.0  ;;  %v5739_v19 = vld [vmem:[#allocation10 + $0xc8] ss:$16 sps:$4 sm:$0xff]   ;;  %v5744_v20 = vld [vmem:[#allocation10 + $0xa4] ss:$16 sps:$4 sm:$0xff]  }
 0x1a4   :  { %v5747_v21 = vld [vmem:[#allocation10 + $0xac] ss:$16 sps:$4 sm:$0xff]  }
 0x1a5   :  { %v1892_v26 = vmax.f32 %v1713_v23, 0.0  ;;  %v1895_v29 = vpack.c.bf16 %v1891_v24, %v1887_v27  ;;  %v5750_v23 = vld [vmem:[#allocation10 + $0x84] ss:$16 sps:$4 sm:$0xff]   ;;  %v5753_v24 = vld [vmem:[#allocation10 + $0x8c] ss:$16 sps:$4 sm:$0xff]  }
 0x1a6   :  { %v5756_v27 = vld [vmem:[#allocation10 + $0x64] ss:$16 sps:$4 sm:$0xff]  }
 0x1a7   :  { %v1896_v28 = vpack.c.bf16 %v1892_v26, %v1888_v25  ;;  %v5748_v25 = vld [vmem:[#allocation10 + $0x80] ss:$16 sps:$4 sm:$0xff]   ;;  %v5751_v26 = vld [vmem:[#allocation10 + $0x88] ss:$16 sps:$4 sm:$0xff]  }
 0x1a9   :  { %2327 = vmatprep.mubr.bf16.mxu0 %v1896_v28  ;;  %v5754_v28 = vld [vmem:[#allocation10 + $0x60] ss:$16 sps:$4 sm:$0xff]  }
 0x1aa   :  { %2328 = vmatmul.mubr.bf16.vlgmr.msra.gmra.mxu0 %v1895_v29  ;;  %v5757_v29 = vld [vmem:[#allocation10 + $0x68] ss:$16 sps:$4 sm:$0xff]  }
 0x1ab   :  { %2642 = vmatprep.mubr.bf16.mxu0 %v6367_v14  ;;  %2611 = vmatpush1.bf16.msra.mxu0 %v5730_v13 }
 0x1ac   :  { %2612 = vmatprep.subr.bf16.mxu0 %v5738_v16 }
 0x1af   :  { %2613 = vmatpush1.bf16.msra.mxu0 %v5736_v18 }
 0x1b0   :  { %2614 = vmatprep.subr.bf16.mxu0 %v5744_v20  ;;  %v5781_v20 = vld [vmem:[#allocation13 + $0x508] ss:$28 sps:$4 sm:$0xff]  }
 0x1b3   :  { %2615 = vmatpush1.bf16.msra.mxu0 %v5742_v22  ;;  %v5786_v22 = vld [vmem:[#allocation13 + $0x154] ss:$28 sps:$4 sm:$0xff]  }
 0x1b4   :  { %2616 = vmatprep.subr.bf16.mxu0 %v5750_v23  ;;  %v5784_v23 = vld [vmem:[#allocation13 + $0x150] ss:$28 sps:$4 sm:$0xff]  }
 0x1b7   :  { %2617 = vmatpush1.bf16.msra.mxu0 %v5748_v25  ;;  %v5792_v25 = vld [vmem:[#allocation13 + $0x11c] ss:$28 sps:$4 sm:$0xff]  }
 0x1b8   :  { %2618 = vmatprep.subr.bf16.mxu0 %v5756_v27  ;;  %v5790_v27 = vld [vmem:[#allocation13 + $0x118] ss:$28 sps:$4 sm:$0xff]  }
 0x1bb   :  { %v1749_v51 = vpop.f32.mrf.mxu1  ;;  %2619 = vmatpush1.bf16.msra.mxu0 %v5754_v28  ;;  %v5793_v28 = vld [vmem:[#allocation13 + $0x498] ss:$28 sps:$4 sm:$0xff]  }
 0x1bc   :  { %v1750_v43 = vadd.f32 %v1749_v51, %v378_v39  ;;  %v5759_v51 = vld [vmem:[#allocation10 + $0x6c] ss:$16 sps:$4 sm:$0xff]  }
 0x1bd   :  { %v1751_v31 = vpop.f32.mrf.mxu1 }
 0x1be   :  { %v1752_v42 = vadd.f32 %v1751_v31, %v382_v38  ;;  %v5765_v31 = vld [vmem:[#allocation10 + $0x4c] ss:$16 sps:$4 sm:$0xff]  }
 0x1bf   :  { %v1753_v36 = vpop.f32.mrf.mxu1 }
 0x1c0   :  { %v1754_v46 = vadd.f32 %v1753_v36, %v378_v39  ;;  %v5763_v36 = vld [vmem:[#allocation10 + $0x48] ss:$16 sps:$4 sm:$0xff]   ;;  %v5766_v39 = vld [vmem:[#allocation10 + $0x20] ss:$16 sps:$4 sm:$0xff]  }
 0x1c1   :  { %v1755_v40 = vpop.f32.mrf.mxu1 }
 0x1c2   :  { %v1756_v54 = vadd.f32 %v1755_v40, %v382_v38  ;;  %v5771_v38 = vld [vmem:[#allocation10 + $0x2c] ss:$16 sps:$4 sm:$0xff]   ;;  %v5769_v40 = vld [vmem:[#allocation10 + $0x28] ss:$16 sps:$4 sm:$0xff]  }
 0x1da   :  { %v1792_v30 = vpop.f32.mrf.mxu0 }
 0x1db   :  { %v1793_v48 = vadd.f32 %v1792_v30, %v1750_v43  ;;  %v5762_v30 = vld [vmem:[#allocation10 + $0x44] ss:$16 sps:$4 sm:$0xff]   ;;  %v5772_v43 = vld [vmem:[#allocation10] ss:$16 sps:$4 sm:$0xff]  }
 0x1dc   :  { %v1794_v32 = vpop.f32.mrf.mxu0  ;;  %2620 = vmatprep.subr.bf16.mxu0 %v5762_v30  ;;  %v5796_v30 = vld [vmem:[#allocation13 + $0xe0] ss:$28 sps:$4 sm:$0xff]  }
 0x1dd   :  { %v1795_v47 = vadd.f32 %v1794_v32, %v1752_v42  ;;  %v5760_v32 = vld [vmem:[#allocation10 + $0x40] ss:$16 sps:$4 sm:$0xff]   ;;  %v5777_v42 = vld [vmem:[#allocation10 + $0xc] ss:$16 sps:$4 sm:$0xff]  }
 0x1de   :  { %v1796_v37 = vpop.f32.mrf.mxu0  ;;  %2621 = vmatpush1.bf16.msra.mxu0 %v5760_v32  ;;  %v5804_v32 = vld [vmem:[#allocation13 + $0xac] ss:$28 sps:$4 sm:$0xff]  }
 0x1df   :  { %v1797_v57 = vadd.f32 %v1796_v37, %v1754_v46  ;;  %v5768_v37 = vld [vmem:[#allocation10 + $0x24] ss:$16 sps:$4 sm:$0xff]   ;;  %v5783_v46 = vld [vmem:[#allocation13 + $0x50c] ss:$28 sps:$4 sm:$0xff]  }
 0x1e0   :  { %v1798_v41 = vpop.f32.mrf.mxu0  ;;  %2622 = vmatprep.subr.bf16.mxu0 %v5768_v37  ;;  %v5802_v37 = vld [vmem:[#allocation13 + $0xa8] ss:$28 sps:$4 sm:$0xff]  }
 0x1e1   :  { %v1799_v11 = vadd.f32 %v1798_v41, %v1756_v54  ;;  %v5774_v41 = vld [vmem:[#allocation10 + $0x4] ss:$16 sps:$4 sm:$0xff]  }
 0x1e2   :  { %2623 = vmatpush1.bf16.msra.mxu0 %v5766_v39  ;;  %v5810_v39 = vld [vmem:[#allocation13 + $0x74] ss:$28 sps:$4 sm:$0xff]  }
 0x1e3   :  { %2624 = vmatprep.subr.bf16.mxu0 %v5774_v41  ;;  %v5808_v41 = vld [vmem:[#allocation13 + $0x70] ss:$28 sps:$4 sm:$0xff]  }
 0x1e6   :  { %2625 = vmatpush1.bf16.msra.mxu0 %v5772_v43  ;;  %v5816_v43 = vld [vmem:[#allocation13 + $0x3c] ss:$28 sps:$4 sm:$0xff]  }
 0x1fa   :  { %v1878_v45 = vpop.f32.mrf.mxu0 }
 0x1fb   :  { %v1835_v44 = vpop.f32.mrf.mxu1 }
 0x1fc   :  { %v1880_v53 = vpop.f32.mrf.mxu0  ;;  %v1836_v4 = vadd.f32 %v1835_v44, %v1793_v48  ;;  %v5775_v44 = vld [vmem:[#allocation10 + $0x8] ss:$16 sps:$4 sm:$0xff]   ;;  %v1963_v48 = vld [vmem:[%s6577_s5] sm:$0x3] }
 0x1fd   :  { %v1837_v50 = vpop.f32.mrf.mxu1  ;;  %v1972_v54 = vrot.slane %v1963_v48, %v6488_v55 }
 0x1fe   :  { %v1838_v58 = vadd.f32 %v1837_v50, %v1795_v47  ;;  %v1882_v60 = vpop.f32.mrf.mxu0  ;;  %v1879_v35 = vadd.f32 %v1878_v45, %v1836_v4  ;;  %v5780_v45 = vld [vmem:[#allocation13 + $0x18c] ss:$28 sps:$4 sm:$0xff]  }
 0x1ff   :  { %v1839_v49 = vpop.f32.mrf.mxu1  ;;  %4153 = vmatprep.subr.bf16.mxu0 %v5780_v45  ;;  %v5814_v45 = vld [vmem:[#allocation13 + $0x38] ss:$28 sps:$4 sm:$0xff]  }
 0x200   :  { %v1840_v61 = vadd.f32 %v1839_v49, %v1797_v57  ;;  %v1881_v62 = vadd.f32 %v1880_v53, %v1838_v58  ;;  %v1884_v1 = vpop.f32.mrf.mxu0  ;;  %v1889_v7 = vmax.f32 %v1879_v35, 0.0  ;;  %v1968_v53 = vrot.slane %v1963_v48, %v6491_v56  ;;  %v5825_v48 = vld [vmem:[#allocation13 + $0x384] ss:$28 sps:$4 sm:$0xff]  }
 0x201   :  { %v1841_v59 = vpop.f32.mrf.mxu1 }
 0x202   :  { %v1883_v63 = vadd.f32 %v1882_v60, %v1840_v61  ;;  %v1842_v0 = vadd.f32 %v1841_v59, %v1799_v11  ;;  %v1890_v5 = vmax.f32 %v1881_v62, 0.0 }
 0x204   :  { %v1885_v2 = vadd.f32 %v1884_v1, %v1842_v0  ;;  %v1893_v3 = vmax.f32 %v1883_v63, 0.0 }
 0x206   :  { %v1894_v6 = vmax.f32 %v1885_v2, 0.0  ;;  %v1897_v9 = vpack.c.bf16 %v1893_v3, %v1889_v7 }
 0x208   :  { %v1898_v8 = vpack.c.bf16 %v1894_v6, %v1890_v5 }
 0x20a   :  { %2370 = vmatprep.mubr.bf16.mxu1 %v1898_v8  ;;  %v5223_v8 = vld [vmem:[#allocation5] sm:$0xff]  }
 0x20b   :  { %2371 = vmatmul.mubr.bf16.vlgmr.msra.gmra.mxu1 %v1897_v9  ;;  %v5224_v9 = vunpack.c.l.bf16 %v5223_v8  ;;  %v5225_v12 = vunpack.c.h.bf16 %v5223_v8  ;;  %v5853_v8 = vld [vmem:[#allocation13 + $0x5e8] ss:$28 sps:$4 sm:$0xff]  }
 0x20c   :  { %2685 = vmatprep.mubr.bf16.mxu1 %v6367_v14  ;;  %2654 = vmatpush1.bf16.msra.mxu1 %v5733_v15  ;;  %v5745_v14 = vld [vmem:[#allocation10 + $0xa8] ss:$16 sps:$4 sm:$0xff]  }
 0x20d   :  { %2655 = vmatprep.subr.bf16.mxu1 %v5741_v17 }
 0x210   :  { %2656 = vmatpush1.bf16.msra.mxu1 %v5739_v19  ;;  %v5778_v19 = vld [vmem:[#allocation13 + $0x188] ss:$28 sps:$4 sm:$0xff]  }
 0x211   :  { %2657 = vmatprep.subr.bf16.mxu1 %v5747_v21 }
 0x214   :  { %2658 = vmatpush1.bf16.msra.mxu1 %v5745_v14  ;;  %v5789_v14 = vld [vmem:[#allocation13 + $0x4d4] ss:$28 sps:$4 sm:$0xff]  }
 0x215   :  { %2659 = vmatprep.subr.bf16.mxu1 %v5753_v24  ;;  %v5787_v24 = vld [vmem:[#allocation13 + $0x4d0] ss:$28 sps:$4 sm:$0xff]  }
 0x218   :  { %2660 = vmatpush1.bf16.msra.mxu1 %v5751_v26  ;;  %v5795_v26 = vld [vmem:[#allocation13 + $0x49c] ss:$28 sps:$4 sm:$0xff]  }
 0x219   :  { %2661 = vmatprep.subr.bf16.mxu1 %v5759_v51  ;;  %v5801_v51 = vld [vmem:[#allocation13 + $0x464] ss:$28 sps:$4 sm:$0xff]  }
 0x21c   :  { %2662 = vmatpush1.bf16.msra.mxu1 %v5757_v29  ;;  %v5798_v29 = vld [vmem:[#allocation13 + $0xe4] ss:$28 sps:$4 sm:$0xff]  }
 0x21d   :  { %2663 = vmatprep.subr.bf16.mxu1 %v5765_v31  ;;  %v5799_v31 = vld [vmem:[#allocation13 + $0x460] ss:$28 sps:$4 sm:$0xff]  }
 0x220   :  { %2664 = vmatpush1.bf16.msra.mxu1 %v5763_v36  ;;  %v5807_v36 = vld [vmem:[#allocation13 + $0x42c] ss:$28 sps:$4 sm:$0xff]  }
 0x221   :  { %2665 = vmatprep.subr.bf16.mxu1 %v5771_v38  ;;  %v5805_v38 = vld [vmem:[#allocation13 + $0x428] ss:$28 sps:$4 sm:$0xff]  }
 0x224   :  { %2666 = vmatpush1.bf16.msra.mxu1 %v5769_v40  ;;  %v5813_v40 = vld [vmem:[#allocation13 + $0x3f4] ss:$28 sps:$4 sm:$0xff]  }
 0x225   :  { %2667 = vmatprep.subr.bf16.mxu1 %v5777_v42  ;;  %v5811_v42 = vld [vmem:[#allocation13 + $0x3f0] ss:$28 sps:$4 sm:$0xff]  }
 0x228   :  { %2668 = vmatpush1.bf16.msra.mxu1 %v5775_v44  ;;  %v5819_v44 = vld [vmem:[#allocation13 + $0x3bc] ss:$28 sps:$4 sm:$0xff]  }
 0x229   :  { %4196 = vmatprep.subr.bf16.mxu1 %v5783_v46  ;;  %v5817_v46 = vld [vmem:[#allocation13 + $0x3b8] ss:$28 sps:$4 sm:$0xff]  }
 0x26a   :  { %v2329_v47 = vpop.f32.mrf.mxu0 }
 0x26b   :  { %v2330_v58 = vadd.f32 %v2329_v47, %v1968_v53  ;;  %v5822_v47 = vld [vmem:[#allocation13 + $0x4] ss:$28 sps:$4 sm:$0xff]  }
 0x26c   :  { %v2331_v50 = vpop.f32.mrf.mxu0 }
 0x26d   :  { %v2332_v49 = vadd.f32 %v2331_v50, %v1972_v54  ;;  %v5820_v50 = vld [vmem:[#allocation13] ss:$28 sps:$4 sm:$0xff]  }
 0x26e   :  { %v2333_v57 = vpop.f32.mrf.mxu0 }
 0x26f   :  { %v2334_v59 = vadd.f32 %v2333_v57, %v1968_v53  ;;  %v5823_v53 = vld [vmem:[#allocation13 + $0x380] ss:$28 sps:$4 sm:$0xff]   ;;  %v5831_v57 = vld [vmem:[#allocation13 + $0x6cc] ss:$28 sps:$4 sm:$0xff]  }
 0x270   :  { %v2335_v11 = vpop.f32.mrf.mxu0 }
 0x271   :  { %v2336_v0 = vadd.f32 %v2335_v11, %v1972_v54  ;;  %v5828_v54 = vld [vmem:[#allocation13 + $0x34c] ss:$28 sps:$4 sm:$0xff]  }
 0x272   :  { %v5832_v11 = vld [vmem:[#allocation13 + $0x310] ss:$28 sps:$4 sm:$0xff]  }
 0x2cb   :  { %v2372_v4 = vpop.f32.mrf.mxu1 }
 0x2cc   :  { %v2373_v60 = vadd.f32 %v2372_v4, %v2330_v58  ;;  %v5826_v58 = vld [vmem:[#allocation13 + $0x348] ss:$28 sps:$4 sm:$0xff]  }
 0x2cd   :  { %v2374_v61 = vpop.f32.mrf.mxu1  ;;  %v5829_v4 = vld [vmem:[#allocation13 + $0x6c8] ss:$28 sps:$4 sm:$0xff]  }
 0x2ce   :  { %4615 = vst [vmem:[#allocation15] sm:$0xff] %v2373_v60  ;;  %v2375_v62 = vadd.f32 %v2374_v61, %v2332_v49  ;;  %v5834_v49 = vld [vmem:[#allocation13 + $0x314] ss:$28 sps:$4 sm:$0xff]  }
 0x2cf   :  { %v2376_v63 = vpop.f32.mrf.mxu1  ;;  %v5835_v61 = vld [vmem:[#allocation13 + $0x690] ss:$28 sps:$4 sm:$0xff]  }
 0x2d0   :  { %v2383_v35 = vmul.f32 0.5, %v2375_v62  ;;  %4616 = vst [vmem:[#allocation15 + $0x8] sm:$0xff] %v2375_v62  ;;  %v2377_v1 = vadd.f32 %v2376_v63, %v2334_v59  ;;  %v5840_v59 = vld [vmem:[#allocation13 + $0x2dc] ss:$28 sps:$4 sm:$0xff]  }
 0x2d1   :  { %v2378_v2 = vpop.f32.mrf.mxu1  ;;  %v5843_v62 = vld [vmem:[#allocation13 + $0x65c] ss:$28 sps:$4 sm:$0xff]  }
 0x2d2   :  { %v2385_v3 = vmul.f32 1.442695, %v2383_v35  ;;  %4617 = vst [vmem:[#allocation15 + $0x10] sm:$0xff] %v2377_v1  ;;  %v2379_v5 = vadd.f32 %v2378_v2, %v2336_v0  ;;  %v5838_v63 = vld [vmem:[#allocation13 + $0x2d8] ss:$28 sps:$4 sm:$0xff]  }
 0x2d3   :  { %v5841_v0 = vld [vmem:[#allocation13 + $0x658] ss:$28 sps:$4 sm:$0xff]   ;;  %v5846_v35 = vld [vmem:[#allocation13 + $0x2a4] ss:$28 sps:$4 sm:$0xff]  }
 0x2d4   :  { %6098 = vpow2.f32 %v2385_v3  ;;  %v2384_v6 = vmul.f32 0.5, %v2379_v5  ;;  %4618 = vst [vmem:[#allocation15 + $0x18] sm:$0xff] %v2379_v5  ;;  %v5844_v2 = vld [vmem:[#allocation13 + $0x2a0] ss:$28 sps:$4 sm:$0xff]   ;;  %v5852_v5 = vld [vmem:[#allocation13 + $0x26c] ss:$28 sps:$4 sm:$0xff]  }
 0x2d5   :  { %v5847_v3 = vld [vmem:[#allocation13 + $0x620] ss:$28 sps:$4 sm:$0xff]  }
 0x2d6   :  { %v2387_v7 = vmul.f32 1.442695, %v2384_v6  ;;  %v5855_v6 = vld [vmem:[#allocation13 + $0x5ec] ss:$28 sps:$4 sm:$0xff]  }
 0x2d8   :  { %6100 = vpow2.f32 %v2387_v7  ;;  %v5850_v7 = vld [vmem:[#allocation13 + $0x268] ss:$28 sps:$4 sm:$0xff]  }
 0x2e1   :  { %v6099_v10 = vpop.eup %6098 }
 0x2e2   :  { %v2391_v13 = vmul.f32 %v6099_v10, %v5224_v9  ;;  %v5858_v9 = vld [vmem:[#allocation13 + $0x234] ss:$28 sps:$4 sm:$0xff]  }
 0x2e3   :  { %v5861_v10 = vld [vmem:[#allocation13 + $0x5b4] ss:$28 sps:$4 sm:$0xff]  }
 0x2e4   :  { %v2393_v17 = vadd.f32 %v2391_v13, %v2373_v60  ;;  %v5837_v60 = vld [vmem:[#allocation13 + $0x694] ss:$28 sps:$4 sm:$0xff]  }
 0x2e5   :  { %v6101_v15 = vpop.eup %6100  ;;  %v5859_v13 = vld [vmem:[#allocation13 + $0x5b0] ss:$28 sps:$4 sm:$0xff]  }
 0x2e6   :  { %v2392_v16 = vmul.f32 %v6101_v15, %v5225_v12  ;;  %v5856_v12 = vld [vmem:[#allocation13 + $0x230] ss:$28 sps:$4 sm:$0xff]   ;;  %v5864_v15 = vld [vmem:[#allocation13 + $0x1fc] ss:$28 sps:$4 sm:$0xff]  }
 0x2e8   :  { %v2394_v18 = vadd.f32 %v2392_v16, %v2377_v1  ;;  %v5849_v1 = vld [vmem:[#allocation13 + $0x624] ss:$28 sps:$4 sm:$0xff]   ;;  %v5867_v16 = vld [vmem:[#allocation13 + $0x57c] ss:$28 sps:$4 sm:$0xff]  }
 0x2ea   :  { %v2395_v21 = vpack.c.bf16 %v2394_v18, %v2393_v17  ;;  %v5862_v17 = vld [vmem:[#allocation13 + $0x1f8] ss:$28 sps:$4 sm:$0xff]  }
 0x2eb   :  { %v5865_v18 = vld [vmem:[#allocation13 + $0x578] ss:$28 sps:$4 sm:$0xff]  }
 0x2ec   :  { %2643 = vmatmul.mubr.bf16.vlgmr.msra.gmra.mxu0 %v2395_v21  ;;  %2686 = vmatmul.mubr.bf16.vlgmr.msra.gmra.mxu1 %v2395_v21  ;;  %v5868_v21 = vld [vmem:[#allocation13 + $0x1c0] ss:$28 sps:$4 sm:$0xff]  }
 0x2ed   :  { %4154 = vmatpush1.bf16.msra.mxu0 %v5778_v19  ;;  %4197 = vmatpush1.bf16.msra.mxu1 %v5781_v20  ;;  %v5870_v19 = vld [vmem:[#allocation13 + $0x1c4] ss:$28 sps:$4 sm:$0xff]  }
 0x2ee   :  { %4155 = vmatprep.subr.bf16.mxu0 %v5786_v22  ;;  %4198 = vmatprep.subr.bf16.mxu1 %v5789_v14  ;;  %v5873_v20 = vld [vmem:[#allocation13 + $0x544] ss:$28 sps:$4 sm:$0xff]   ;;  %v5876_v14 = vld [vmem:[#allocation13 + $0x194] ss:$28 sps:$4 sm:$0xff]  }
 0x2ef   :  { %v5871_v22 = vld [vmem:[#allocation13 + $0x540] ss:$28 sps:$4 sm:$0xff]  }
 0x2f1   :  { %4156 = vmatpush1.bf16.msra.mxu0 %v5784_v23  ;;  %4199 = vmatpush1.bf16.msra.mxu1 %v5787_v24  ;;  %v5879_v23 = vld [vmem:[#allocation13 + $0x514] ss:$28 sps:$4 sm:$0xff]   ;;  %v2428_v24 = vld [vmem:[#allocation11] sm:$0xf] }
 0x2f2   :  { %4157 = vmatprep.subr.bf16.mxu0 %v5792_v25  ;;  %4200 = vmatprep.subr.bf16.mxu1 %v5795_v26 }
 0x2f5   :  { %4158 = vmatpush1.bf16.msra.mxu0 %v5790_v27  ;;  %4201 = vmatpush1.bf16.msra.mxu1 %v5793_v28  ;;  %v2437_v27 = vrot.slane %v2428_v24, %v6488_v55  ;;  %v2445_v28 = vrot.slane %v2428_v24, %v6500_v33 }
 0x2f6   :  { %4159 = vmatprep.subr.bf16.mxu0 %v5798_v29  ;;  %4202 = vmatprep.subr.bf16.mxu1 %v5801_v51  ;;  %v2433_v29 = vrot.slane %v2428_v24, %v6491_v56  ;;  %v2441_v51 = vrot.slane %v2428_v24, %v6503_v34  ;;  %v5918_v24 = vld [vmem:[#allocation13 + $0xc] ss:$28 sps:$4 sm:$0xff]  }
 0x2f9   :  { %4160 = vmatpush1.bf16.msra.mxu0 %v5796_v30  ;;  %4203 = vmatpush1.bf16.msra.mxu1 %v5799_v31 }
 0x2fa   :  { %4161 = vmatprep.subr.bf16.mxu0 %v5804_v32  ;;  %4204 = vmatprep.subr.bf16.mxu1 %v5807_v36 }
 0x2fd   :  { %4162 = vmatpush1.bf16.msra.mxu0 %v5802_v37  ;;  %4205 = vmatpush1.bf16.msra.mxu1 %v5805_v38 }
 0x2fe   :  { %4163 = vmatprep.subr.bf16.mxu0 %v5810_v39  ;;  %4206 = vmatprep.subr.bf16.mxu1 %v5813_v40 }
 0x301   :  { %4164 = vmatpush1.bf16.msra.mxu0 %v5808_v41  ;;  %4207 = vmatpush1.bf16.msra.mxu1 %v5811_v42 }
 0x302   :  { %4165 = vmatprep.subr.bf16.mxu0 %v5816_v43  ;;  %4208 = vmatprep.subr.bf16.mxu1 %v5819_v44 }
 0x305   :  { %4166 = vmatpush1.bf16.msra.mxu0 %v5814_v45  ;;  %4209 = vmatpush1.bf16.msra.mxu1 %v5817_v46 }
 0x306   :  { %4167 = vmatprep.subr.bf16.mxu0 %v5822_v47  ;;  %4210 = vmatprep.subr.bf16.mxu1 %v5825_v48 }
 0x309   :  { %4168 = vmatpush1.bf16.msra.mxu0 %v5820_v50  ;;  %4211 = vmatpush1.bf16.msra.mxu1 %v5823_v53 }
 0x30a   :  { %4169 = vmatprep.subr.bf16.mxu0 %v5828_v54  ;;  %4212 = vmatprep.subr.bf16.mxu1 %v5831_v57 }
 0x30d   :  { %4170 = vmatpush2.bf16.msra.mxu0 %v5826_v58  ;;  %4213 = vmatpush2.bf16.msra.mxu1 %v5829_v4 }
 0x30e   :  { %4171 = vmatprep.subr.bf16.mxu0 %v5834_v49  ;;  %4214 = vmatprep.subr.bf16.mxu1 %v5837_v60 }
 0x311   :  { %4172 = vmatpush2.bf16.msra.mxu0 %v5832_v11  ;;  %4215 = vmatpush2.bf16.msra.mxu1 %v5835_v61  ;;  %v5874_v11 = vld [vmem:[#allocation13 + $0x190] ss:$28 sps:$4 sm:$0xff]  }
 0x312   :  { %4173 = vmatprep.subr.bf16.mxu0 %v5840_v59  ;;  %4216 = vmatprep.subr.bf16.mxu1 %v5843_v62  ;;  %v5877_v61 = vld [vmem:[#allocation13 + $0x510] ss:$28 sps:$4 sm:$0xff]  }
 0x315   :  { %4174 = vmatpush2.bf16.msra.mxu0 %v5838_v63  ;;  %4217 = vmatpush2.bf16.msra.mxu1 %v5841_v0  ;;  %v5882_v63 = vld [vmem:[#allocation13 + $0x15c] ss:$28 sps:$4 sm:$0xff]  }
 0x316   :  { %4175 = vmatprep.subr.bf16.mxu0 %v5846_v35  ;;  %4218 = vmatprep.subr.bf16.mxu1 %v5849_v1  ;;  %v5885_v0 = vld [vmem:[#allocation13 + $0x4dc] ss:$28 sps:$4 sm:$0xff]  }
 0x317   :  { %v5880_v35 = vld [vmem:[#allocation13 + $0x158] ss:$28 sps:$4 sm:$0xff]  }
 0x318   :  { %v5883_v1 = vld [vmem:[#allocation13 + $0x4d8] ss:$28 sps:$4 sm:$0xff]  }
 0x319   :  { %4176 = vmatpush2.bf16.msra.mxu0 %v5844_v2  ;;  %4219 = vmatpush2.bf16.msra.mxu1 %v5847_v3  ;;  %v5888_v2 = vld [vmem:[#allocation13 + $0x124] ss:$28 sps:$4 sm:$0xff]  }
 0x31a   :  { %4177 = vmatprep.subr.bf16.mxu0 %v5852_v5  ;;  %4220 = vmatprep.subr.bf16.mxu1 %v5855_v6  ;;  %v5891_v3 = vld [vmem:[#allocation13 + $0x4a4] ss:$28 sps:$4 sm:$0xff]  }
 0x31b   :  { %v5886_v5 = vld [vmem:[#allocation13 + $0x120] ss:$28 sps:$4 sm:$0xff]  }
 0x31c   :  { %v5889_v6 = vld [vmem:[#allocation13 + $0x4a0] ss:$28 sps:$4 sm:$0xff]  }
 0x31d   :  { %4178 = vmatpush2.bf16.msra.mxu0 %v5850_v7  ;;  %4221 = vmatpush2.bf16.msra.mxu1 %v5853_v8  ;;  %v5894_v7 = vld [vmem:[#allocation13 + $0xec] ss:$28 sps:$4 sm:$0xff]  }
 0x31e   :  { %4179 = vmatprep.subr.bf16.mxu0 %v5858_v9  ;;  %4222 = vmatprep.subr.bf16.mxu1 %v5861_v10  ;;  %v5897_v8 = vld [vmem:[#allocation13 + $0x46c] ss:$28 sps:$4 sm:$0xff]  }
 0x31f   :  { %v5892_v9 = vld [vmem:[#allocation13 + $0xe8] ss:$28 sps:$4 sm:$0xff]  }
 0x320   :  { %v5895_v10 = vld [vmem:[#allocation13 + $0x468] ss:$28 sps:$4 sm:$0xff]  }
 0x321   :  { %4180 = vmatpush2.bf16.msra.mxu0 %v5856_v12  ;;  %4223 = vmatpush2.bf16.msra.mxu1 %v5859_v13  ;;  %v5900_v12 = vld [vmem:[#allocation13 + $0xb4] ss:$28 sps:$4 sm:$0xff]  }
 0x322   :  { %4181 = vmatprep.subr.bf16.mxu0 %v5864_v15  ;;  %4224 = vmatprep.subr.bf16.mxu1 %v5867_v16  ;;  %v5903_v13 = vld [vmem:[#allocation13 + $0x434] ss:$28 sps:$4 sm:$0xff]  }
 0x323   :  { %v5898_v15 = vld [vmem:[#allocation13 + $0xb0] ss:$28 sps:$4 sm:$0xff]  }
 0x324   :  { %v5901_v16 = vld [vmem:[#allocation13 + $0x430] ss:$28 sps:$4 sm:$0xff]  }
 0x325   :  { %4182 = vmatpush2.bf16.msra.mxu0 %v5862_v17  ;;  %4225 = vmatpush2.bf16.msra.mxu1 %v5865_v18  ;;  %v5906_v17 = vld [vmem:[#allocation13 + $0x7c] ss:$28 sps:$4 sm:$0xff]  }
 0x326   :  { %4183 = vmatprep.subr.bf16.mxu0 %v5870_v19  ;;  %4226 = vmatprep.subr.bf16.mxu1 %v5873_v20  ;;  %v5909_v18 = vld [vmem:[#allocation13 + $0x3fc] ss:$28 sps:$4 sm:$0xff]  }
 0x327   :  { %v5904_v19 = vld [vmem:[#allocation13 + $0x78] ss:$28 sps:$4 sm:$0xff]  }
 0x328   :  { %v5907_v20 = vld [vmem:[#allocation13 + $0x3f8] ss:$28 sps:$4 sm:$0xff]  }
 0x329   :  { %4184 = vmatpush2.bf16.msra.mxu0 %v5868_v21  ;;  %4227 = vmatpush2.bf16.msra.mxu1 %v5871_v22  ;;  %v5912_v21 = vld [vmem:[#allocation13 + $0x44] ss:$28 sps:$4 sm:$0xff]  }
 0x32a   :  { %4239 = vmatprep.subr.bf16.mxu0 %v5876_v14  ;;  %4282 = vmatprep.subr.bf16.mxu1 %v5879_v23  ;;  %v5915_v22 = vld [vmem:[#allocation13 + $0x3c4] ss:$28 sps:$4 sm:$0xff]  }
 0x32b   :  { %v5910_v14 = vld [vmem:[#allocation13 + $0x40] ss:$28 sps:$4 sm:$0xff]  }
 0x32c   :  { %v5913_v23 = vld [vmem:[#allocation13 + $0x3c0] ss:$28 sps:$4 sm:$0xff]  }
 0x3ac   :  { %v2644_v25 = vpop.f32.mrf.mxu0  ;;  %v2687_v26 = vpop.f32.mrf.mxu1 }
 0x3ad   :  { %v2645_v41 = vadd.f32 %v2644_v25, %v2433_v29  ;;  %v2688_v42 = vadd.f32 %v2687_v26, %v2441_v51  ;;  %v5921_v25 = vld [vmem:[#allocation13 + $0x38c] ss:$28 sps:$4 sm:$0xff]  }
 0x3ae   :  { %v2646_v30 = vpop.f32.mrf.mxu0  ;;  %v2689_v31 = vpop.f32.mrf.mxu1  ;;  %v5916_v26 = vld [vmem:[#allocation13 + $0x8] ss:$28 sps:$4 sm:$0xff]  }
 0x3af   :  { %v2647_v37 = vadd.f32 %v2646_v30, %v2437_v27  ;;  %v2690_v38 = vadd.f32 %v2689_v31, %v2445_v28  ;;  %v2696_v58 = vmax.f32 %v2645_v41, 0.0  ;;  %v2698_v4 = vmax.f32 %v2688_v42, 0.0  ;;  %v5925_v30 = vld [vmem:[#allocation13 + $0x6d0] ss:$28 sps:$4 sm:$0xff]   ;;  %v5930_v31 = vld [vmem:[#allocation13 + $0x31c] ss:$28 sps:$4 sm:$0xff]  }
 0x3b0   :  { %v2648_v32 = vpop.f32.mrf.mxu0  ;;  %v2691_v36 = vpop.f32.mrf.mxu1  ;;  %v5937_v41 = vld [vmem:[#allocation13 + $0x660] ss:$28 sps:$4 sm:$0xff]   ;;  %v5942_v42 = vld [vmem:[#allocation13 + $0x2ac] ss:$28 sps:$4 sm:$0xff]  }
 0x3b1   :  { %v2649_v39 = vadd.f32 %v2648_v32, %v2433_v29  ;;  %v2692_v40 = vadd.f32 %v2691_v36, %v2441_v51  ;;  %v2697_v50 = vmax.f32 %v2647_v37, 0.0  ;;  %v2699_v53 = vmax.f32 %v2690_v38, 0.0  ;;  %v5927_v29 = vld [vmem:[#allocation13 + $0x6d4] ss:$28 sps:$4 sm:$0xff]   ;;  %v5933_v32 = vld [vmem:[#allocation13 + $0x69c] ss:$28 sps:$4 sm:$0xff]  }
 0x3b2   :  { %v2650_v43 = vpop.f32.mrf.mxu0  ;;  %v2693_v44 = vpop.f32.mrf.mxu1  ;;  %v5922_v51 = vld [vmem:[#allocation13 + $0x350] ss:$28 sps:$4 sm:$0xff]   ;;  %v5928_v36 = vld [vmem:[#allocation13 + $0x318] ss:$28 sps:$4 sm:$0xff]   ;;  %v5936_v38 = vld [vmem:[#allocation13 + $0x2e4] ss:$28 sps:$4 sm:$0xff]  }
 0x3b3   :  { %v2651_v45 = vadd.f32 %v2650_v43, %v2437_v27  ;;  %v2694_v46 = vadd.f32 %v2693_v44, %v2445_v28  ;;  %v2700_v47 = vmax.f32 %v2649_v39, 0.0  ;;  %v2702_v48 = vmax.f32 %v2692_v40, 0.0  ;;  %v5919_v27 = vld [vmem:[#allocation13 + $0x388] ss:$28 sps:$4 sm:$0xff]   ;;  %v5924_v28 = vld [vmem:[#allocation13 + $0x354] ss:$28 sps:$4 sm:$0xff]  }
 0x3b4   :  { %v5931_v37 = vld [vmem:[#allocation13 + $0x698] ss:$28 sps:$4 sm:$0xff]   ;;  %v5939_v39 = vld [vmem:[#allocation13 + $0x664] ss:$28 sps:$4 sm:$0xff]   ;;  %v5945_v43 = vld [vmem:[#allocation13 + $0x62c] ss:$28 sps:$4 sm:$0xff]  }
 0x3b5   :  { %v2701_v54 = vmax.f32 %v2651_v45, 0.0  ;;  %v2703_v57 = vmax.f32 %v2694_v46, 0.0  ;;  %v6521_v59 = vpack.c.bf16 %v2700_v47, %v2696_v58  ;;  %v6523_v62 = vpack.c.bf16 %v2702_v48, %v2698_v4  ;;  %v5934_v40 = vld [vmem:[#allocation13 + $0x2e0] ss:$28 sps:$4 sm:$0xff]   ;;  %v5940_v44 = vld [vmem:[#allocation13 + $0x2a8] ss:$28 sps:$4 sm:$0xff]  }
 0x3b6   :  { %v5943_v45 = vld [vmem:[#allocation13 + $0x628] ss:$28 sps:$4 sm:$0xff]   ;;  %v5948_v46 = vld [vmem:[#allocation13 + $0x274] ss:$28 sps:$4 sm:$0xff]  }
 0x3b7   :  { %v6517_v49 = vpack.c.bf16 %v2701_v54, %v2697_v50  ;;  %v6519_v60 = vpack.c.bf16 %v2703_v57, %v2699_v53  ;;  %v5951_v47 = vld [vmem:[#allocation13 + $0x5f4] ss:$28 sps:$4 sm:$0xff]   ;;  %v5954_v53 = vld [vmem:[#allocation13 + $0x23c] ss:$28 sps:$4 sm:$0xff]   ;;  %v5960_v4 = vld [vmem:[#allocation13 + $0x204] ss:$28 sps:$4 sm:$0xff]  }
 0x3b8   :  { %v5946_v48 = vld [vmem:[#allocation13 + $0x270] ss:$28 sps:$4 sm:$0xff]   ;;  %v5957_v54 = vld [vmem:[#allocation13 + $0x5bc] ss:$28 sps:$4 sm:$0xff]  }
 0x3b9   :  { %4185 = vmatprep.mubr.bf16.mxu0 %v6517_v49  ;;  %4228 = vmatprep.mubr.bf16.mxu1 %v6519_v60  ;;  %v5949_v50 = vld [vmem:[#allocation13 + $0x5f0] ss:$28 sps:$4 sm:$0xff]   ;;  %v5952_v57 = vld [vmem:[#allocation13 + $0x238] ss:$28 sps:$4 sm:$0xff]  }
 0x3ba   :  { %4186 = vmatmul.mubr.bf16.vlgmr.msra.gmra.mxu0 %v6521_v59  ;;  %4229 = vmatmul.mubr.bf16.vlgmr.msra.gmra.mxu1 %v6523_v62  ;;  %v5955_v58 = vld [vmem:[#allocation13 + $0x5b8] ss:$28 sps:$4 sm:$0xff]  }
 0x3bb   :  { %4240 = vmatpush1.bf16.msra.mxu0 %v5874_v11  ;;  %4283 = vmatpush1.bf16.msra.mxu1 %v5877_v61  ;;  %v5963_v11 = vld [vmem:[#allocation13 + $0x584] ss:$28 sps:$4 sm:$0xff]  }
 0x3bc   :  { %4271 = vmatprep.mubr.bf16.mxu0 %v6517_v49  ;;  %4314 = vmatprep.mubr.bf16.mxu1 %v6519_v60  ;;  %v5958_v61 = vld [vmem:[#allocation13 + $0x200] ss:$28 sps:$4 sm:$0xff]  }
 0x3bd   :  { %4241 = vmatprep.subr.bf16.mxu0 %v5882_v63  ;;  %4284 = vmatprep.subr.bf16.mxu1 %v5885_v0  ;;  %v5961_v63 = vld [vmem:[#allocation13 + $0x580] ss:$28 sps:$4 sm:$0xff]   ;;  %v5966_v0 = vld [vmem:[#allocation13 + $0x1cc] ss:$28 sps:$4 sm:$0xff]  }
 0x3bf   :  { %4242 = vmatpush1.bf16.msra.mxu0 %v5880_v35  ;;  %4285 = vmatpush1.bf16.msra.mxu1 %v5883_v1  ;;  %v5969_v35 = vld [vmem:[#allocation13 + $0x54c] ss:$28 sps:$4 sm:$0xff]  }
 0x3c0   :  { %4243 = vmatprep.subr.bf16.mxu0 %v5888_v2  ;;  %4286 = vmatprep.subr.bf16.mxu1 %v5891_v3  ;;  %v5964_v1 = vld [vmem:[#allocation13 + $0x1c8] ss:$28 sps:$4 sm:$0xff]   ;;  %v5972_v3 = vld [vmem:[#allocation13 + $0x19c] ss:$28 sps:$4 sm:$0xff]  }
 0x3c1   :  { %v5967_v2 = vld [vmem:[#allocation13 + $0x548] ss:$28 sps:$4 sm:$0xff]  }
 0x3c3   :  { %4244 = vmatpush1.bf16.msra.mxu0 %v5886_v5  ;;  %4287 = vmatpush1.bf16.msra.mxu1 %v5889_v6  ;;  %v5975_v5 = vld [vmem:[#allocation13 + $0x51c] ss:$28 sps:$4 sm:$0xff]  }
 0x3c4   :  { %4245 = vmatprep.subr.bf16.mxu0 %v5894_v7  ;;  %4288 = vmatprep.subr.bf16.mxu1 %v5897_v8  ;;  %v5970_v6 = vld [vmem:[#allocation13 + $0x198] ss:$28 sps:$4 sm:$0xff]   ;;  %v5978_v8 = vld [vmem:[#allocation13 + $0x164] ss:$28 sps:$4 sm:$0xff]  }
 0x3c5   :  { %v5973_v7 = vld [vmem:[#allocation13 + $0x518] ss:$28 sps:$4 sm:$0xff]  }
 0x3c7   :  { %4246 = vmatpush1.bf16.msra.mxu0 %v5892_v9  ;;  %4289 = vmatpush1.bf16.msra.mxu1 %v5895_v10  ;;  %v5981_v9 = vld [vmem:[#allocation13 + $0x4e4] ss:$28 sps:$4 sm:$0xff]  }
 0x3c8   :  { %4247 = vmatprep.subr.bf16.mxu0 %v5900_v12  ;;  %4290 = vmatprep.subr.bf16.mxu1 %v5903_v13  ;;  %v5976_v10 = vld [vmem:[#allocation13 + $0x160] ss:$28 sps:$4 sm:$0xff]   ;;  %v5984_v13 = vld [vmem:[#allocation13 + $0x12c] ss:$28 sps:$4 sm:$0xff]  }
 0x3c9   :  { %v5979_v12 = vld [vmem:[#allocation13 + $0x4e0] ss:$28 sps:$4 sm:$0xff]  }
 0x3cb   :  { %4248 = vmatpush1.bf16.msra.mxu0 %v5898_v15  ;;  %4291 = vmatpush1.bf16.msra.mxu1 %v5901_v16  ;;  %v5987_v15 = vld [vmem:[#allocation13 + $0x4ac] ss:$28 sps:$4 sm:$0xff]  }
 0x3cc   :  { %4249 = vmatprep.subr.bf16.mxu0 %v5906_v17  ;;  %4292 = vmatprep.subr.bf16.mxu1 %v5909_v18  ;;  %v5982_v16 = vld [vmem:[#allocation13 + $0x128] ss:$28 sps:$4 sm:$0xff]   ;;  %v5990_v18 = vld [vmem:[#allocation13 + $0xf4] ss:$28 sps:$4 sm:$0xff]  }
 0x3cd   :  { %v5985_v17 = vld [vmem:[#allocation13 + $0x4a8] ss:$28 sps:$4 sm:$0xff]  }
 0x3cf   :  { %4250 = vmatpush1.bf16.msra.mxu0 %v5904_v19  ;;  %4293 = vmatpush1.bf16.msra.mxu1 %v5907_v20  ;;  %v5993_v19 = vld [vmem:[#allocation13 + $0x474] ss:$28 sps:$4 sm:$0xff]  }
 0x3d0   :  { %4251 = vmatprep.subr.bf16.mxu0 %v5912_v21  ;;  %4294 = vmatprep.subr.bf16.mxu1 %v5915_v22  ;;  %v5988_v20 = vld [vmem:[#allocation13 + $0xf0] ss:$28 sps:$4 sm:$0xff]   ;;  %v5996_v22 = vld [vmem:[#allocation13 + $0xbc] ss:$28 sps:$4 sm:$0xff]  }
 0x3d1   :  { %v5991_v21 = vld [vmem:[#allocation13 + $0x470] ss:$28 sps:$4 sm:$0xff]  }
 0x3d3   :  { %4252 = vmatpush1.bf16.msra.mxu0 %v5910_v14  ;;  %4295 = vmatpush1.bf16.msra.mxu1 %v5913_v23  ;;  %v5999_v14 = vld [vmem:[#allocation13 + $0x43c] ss:$28 sps:$4 sm:$0xff]  }
 0x3d4   :  { %4253 = vmatprep.subr.bf16.mxu0 %v5918_v24  ;;  %4296 = vmatprep.subr.bf16.mxu1 %v5921_v25  ;;  %v5994_v23 = vld [vmem:[#allocation13 + $0xb8] ss:$28 sps:$4 sm:$0xff]   ;;  %v6002_v25 = vld [vmem:[#allocation13 + $0x84] ss:$28 sps:$4 sm:$0xff]  }
 0x3d5   :  { %v5997_v24 = vld [vmem:[#allocation13 + $0x438] ss:$28 sps:$4 sm:$0xff]  }
 0x3d7   :  { %4254 = vmatpush1.bf16.msra.mxu0 %v5916_v26  ;;  %4297 = vmatpush1.bf16.msra.mxu1 %v5919_v27  ;;  %v6005_v26 = vld [vmem:[#allocation13 + $0x404] ss:$28 sps:$4 sm:$0xff]  }
 0x3d8   :  { %4255 = vmatprep.subr.bf16.mxu0 %v5924_v28  ;;  %4298 = vmatprep.subr.bf16.mxu1 %v5927_v29  ;;  %v6000_v27 = vld [vmem:[#allocation13 + $0x80] ss:$28 sps:$4 sm:$0xff]   ;;  %v6008_v29 = vld [vmem:[#allocation13 + $0x4c] ss:$28 sps:$4 sm:$0xff]  }
 0x3d9   :  { %v6003_v28 = vld [vmem:[#allocation13 + $0x400] ss:$28 sps:$4 sm:$0xff]  }
 0x3db   :  { %4256 = vmatpush2.bf16.msra.mxu0 %v5922_v51  ;;  %4299 = vmatpush2.bf16.msra.mxu1 %v5925_v30  ;;  %v6011_v51 = vld [vmem:[#allocation13 + $0x3cc] ss:$28 sps:$4 sm:$0xff]  }
 0x3dc   :  { %4257 = vmatprep.subr.bf16.mxu0 %v5930_v31  ;;  %4300 = vmatprep.subr.bf16.mxu1 %v5933_v32  ;;  %v6006_v30 = vld [vmem:[#allocation13 + $0x48] ss:$28 sps:$4 sm:$0xff]   ;;  %v6014_v32 = vld [vmem:[#allocation13 + $0x14] ss:$28 sps:$4 sm:$0xff]  }
 0x3dd   :  { %v6009_v31 = vld [vmem:[#allocation13 + $0x3c8] ss:$28 sps:$4 sm:$0xff]  }
 0x3df   :  { %4258 = vmatpush2.bf16.msra.mxu0 %v5928_v36  ;;  %4301 = vmatpush2.bf16.msra.mxu1 %v5931_v37  ;;  %v6017_v36 = vld [vmem:[#allocation13 + $0x394] ss:$28 sps:$4 sm:$0xff]  }
 0x3e0   :  { %4259 = vmatprep.subr.bf16.mxu0 %v5936_v38  ;;  %4302 = vmatprep.subr.bf16.mxu1 %v5939_v39  ;;  %v6012_v37 = vld [vmem:[#allocation13 + $0x10] ss:$28 sps:$4 sm:$0xff]   ;;  %v6020_v39 = vld [vmem:[#allocation13 + $0x35c] ss:$28 sps:$4 sm:$0xff]  }
 0x3e1   :  { %v6015_v38 = vld [vmem:[#allocation13 + $0x390] ss:$28 sps:$4 sm:$0xff]  }
 0x3e3   :  { %4260 = vmatpush2.bf16.msra.mxu0 %v5934_v40  ;;  %4303 = vmatpush2.bf16.msra.mxu1 %v5937_v41  ;;  %v6023_v40 = vld [vmem:[#allocation13 + $0x6dc] ss:$28 sps:$4 sm:$0xff]  }
 0x3e4   :  { %4261 = vmatprep.subr.bf16.mxu0 %v5942_v42  ;;  %4304 = vmatprep.subr.bf16.mxu1 %v5945_v43  ;;  %v6018_v41 = vld [vmem:[#allocation13 + $0x358] ss:$28 sps:$4 sm:$0xff]   ;;  %v6026_v43 = vld [vmem:[#allocation13 + $0x324] ss:$28 sps:$4 sm:$0xff]  }
 0x3e5   :  { %v6021_v42 = vld [vmem:[#allocation13 + $0x6d8] ss:$28 sps:$4 sm:$0xff]  }
 0x3e7   :  { %4262 = vmatpush2.bf16.msra.mxu0 %v5940_v44  ;;  %4305 = vmatpush2.bf16.msra.mxu1 %v5943_v45  ;;  %v6029_v44 = vld [vmem:[#allocation13 + $0x6a4] ss:$28 sps:$4 sm:$0xff]  }
 0x3e8   :  { %4263 = vmatprep.subr.bf16.mxu0 %v5948_v46  ;;  %4306 = vmatprep.subr.bf16.mxu1 %v5951_v47  ;;  %v6024_v45 = vld [vmem:[#allocation13 + $0x320] ss:$28 sps:$4 sm:$0xff]   ;;  %v6032_v47 = vld [vmem:[#allocation13 + $0x2ec] ss:$28 sps:$4 sm:$0xff]  }
 0x3e9   :  { %v6027_v46 = vld [vmem:[#allocation13 + $0x6a0] ss:$28 sps:$4 sm:$0xff]  }
 0x3eb   :  { %4264 = vmatpush2.bf16.msra.mxu0 %v5946_v48  ;;  %4307 = vmatpush2.bf16.msra.mxu1 %v5949_v50  ;;  %v6035_v48 = vld [vmem:[#allocation13 + $0x66c] ss:$28 sps:$4 sm:$0xff]  }
 0x3ec   :  { %4265 = vmatprep.subr.bf16.mxu0 %v5954_v53  ;;  %4308 = vmatprep.subr.bf16.mxu1 %v5957_v54  ;;  %v6030_v50 = vld [vmem:[#allocation13 + $0x2e8] ss:$28 sps:$4 sm:$0xff]   ;;  %v6038_v54 = vld [vmem:[#allocation13 + $0x2b4] ss:$28 sps:$4 sm:$0xff]  }
 0x3ed   :  { %v6033_v53 = vld [vmem:[#allocation13 + $0x668] ss:$28 sps:$4 sm:$0xff]  }
 0x3ef   :  { %4266 = vmatpush2.bf16.msra.mxu0 %v5952_v57  ;;  %4309 = vmatpush2.bf16.msra.mxu1 %v5955_v58  ;;  %v6041_v57 = vld [vmem:[#allocation13 + $0x634] ss:$28 sps:$4 sm:$0xff]  }
 0x3f0   :  { %4267 = vmatprep.subr.bf16.mxu0 %v5960_v4  ;;  %4310 = vmatprep.subr.bf16.mxu1 %v5963_v11  ;;  %v6036_v58 = vld [vmem:[#allocation13 + $0x2b0] ss:$28 sps:$4 sm:$0xff]   ;;  %v6044_v11 = vld [vmem:[#allocation13 + $0x27c] ss:$28 sps:$4 sm:$0xff]  }
 0x3f1   :  { %v6039_v4 = vld [vmem:[#allocation13 + $0x630] ss:$28 sps:$4 sm:$0xff]  }
 0x3f3   :  { %4268 = vmatpush2.bf16.msra.mxu0 %v5958_v61  ;;  %4311 = vmatpush2.bf16.msra.mxu1 %v5961_v63  ;;  %v6047_v61 = vld [vmem:[#allocation13 + $0x5fc] ss:$28 sps:$4 sm:$0xff]  }
 0x3f4   :  { %4269 = vmatprep.subr.bf16.mxu0 %v5966_v0  ;;  %4312 = vmatprep.subr.bf16.mxu1 %v5969_v35  ;;  %v6042_v63 = vld [vmem:[#allocation13 + $0x278] ss:$28 sps:$4 sm:$0xff]   ;;  %v6050_v35 = vld [vmem:[#allocation13 + $0x244] ss:$28 sps:$4 sm:$0xff]  }
 0x3f5   :  { %v6045_v0 = vld [vmem:[#allocation13 + $0x5f8] ss:$28 sps:$4 sm:$0xff]  }
 0x3f7   :  { %4270 = vmatpush2.bf16.msra.mxu0 %v5964_v1  ;;  %4313 = vmatpush2.bf16.msra.mxu1 %v5967_v2  ;;  %v6053_v1 = vld [vmem:[#allocation13 + $0x5c4] ss:$28 sps:$4 sm:$0xff]  }
 0x3f8   :  { %4325 = vmatprep.subr.bf16.mxu0 %v5972_v3  ;;  %4368 = vmatprep.subr.bf16.mxu1 %v5975_v5  ;;  %v6048_v2 = vld [vmem:[#allocation13 + $0x240] ss:$28 sps:$4 sm:$0xff]   ;;  %v6056_v5 = vld [vmem:[#allocation13 + $0x20c] ss:$28 sps:$4 sm:$0xff]  }
 0x3f9   :  { %v6051_v3 = vld [vmem:[#allocation13 + $0x5c0] ss:$28 sps:$4 sm:$0xff]  }
 0x3fa   :  { %4272 = vmatmul.mubr.bf16.vlgmr.msra.gmra.mxu0 %v6521_v59  ;;  %4315 = vmatmul.mubr.bf16.vlgmr.msra.gmra.mxu1 %v6523_v62 }
 0x3fb   :  { %4326 = vmatpush1.bf16.msra.mxu0 %v5970_v6  ;;  %4357 = vmatprep.mubr.bf16.mxu0 %v6517_v49  ;;  %v6059_v6 = vld [vmem:[#allocation13 + $0x58c] ss:$28 sps:$4 sm:$0xff]  }
 0x3fc   :  { %4369 = vmatpush1.bf16.msra.mxu1 %v5973_v7  ;;  %4400 = vmatprep.mubr.bf16.mxu1 %v6519_v60  ;;  %v6054_v7 = vld [vmem:[#allocation13 + $0x208] ss:$28 sps:$4 sm:$0xff]  }
 0x3fd   :  { %4327 = vmatprep.subr.bf16.mxu0 %v5978_v8  ;;  %4370 = vmatprep.subr.bf16.mxu1 %v5981_v9  ;;  %v6057_v8 = vld [vmem:[#allocation13 + $0x588] ss:$28 sps:$4 sm:$0xff]   ;;  %v6062_v9 = vld [vmem:[#allocation13 + $0x1d4] ss:$28 sps:$4 sm:$0xff]  }
 0x3ff   :  { %4328 = vmatpush1.bf16.msra.mxu0 %v5976_v10  ;;  %v6065_v10 = vld [vmem:[#allocation13 + $0x554] ss:$28 sps:$4 sm:$0xff]  }
 0x400   :  { %4371 = vmatpush1.bf16.msra.mxu1 %v5979_v12  ;;  %4329 = vmatprep.subr.bf16.mxu0 %v5984_v13  ;;  %v6060_v12 = vld [vmem:[#allocation13 + $0x1d0] ss:$28 sps:$4 sm:$0xff]  }
 0x401   :  { %4372 = vmatprep.subr.bf16.mxu1 %v5987_v15  ;;  %v6063_v13 = vld [vmem:[#allocation13 + $0x550] ss:$28 sps:$4 sm:$0xff]   ;;  %v6066_v15 = vld [vmem:[#allocation13 + $0x360] ss:$28 sps:$4 sm:$0xff]  }
 0x403   :  { %4330 = vmatpush1.bf16.msra.mxu0 %v5982_v16  ;;  %v6067_v16 = vld [vmem:[#allocation13 + $0x6e0] ss:$28 sps:$4 sm:$0xff]  }
 0x404   :  { %4373 = vmatpush1.bf16.msra.mxu1 %v5985_v17  ;;  %4331 = vmatprep.subr.bf16.mxu0 %v5990_v18  ;;  %v6068_v17 = vld [vmem:[#allocation13 + $0x1a0] ss:$28 sps:$4 sm:$0xff]  }
 0x405   :  { %4374 = vmatprep.subr.bf16.mxu1 %v5993_v19  ;;  %v6069_v18 = vld [vmem:[#allocation13 + $0x520] ss:$28 sps:$4 sm:$0xff]   ;;  %v6070_v19 = vld [vmem:[#allocation13 + $0x328] ss:$28 sps:$4 sm:$0xff]  }
 0x407   :  { %4332 = vmatpush1.bf16.msra.mxu0 %v5988_v20  ;;  %v6071_v20 = vld [vmem:[#allocation13 + $0x6a8] ss:$28 sps:$4 sm:$0xff]  }
 0x408   :  { %4375 = vmatpush1.bf16.msra.mxu1 %v5991_v21  ;;  %4333 = vmatprep.subr.bf16.mxu0 %v5996_v22  ;;  %v6072_v21 = vld [vmem:[#allocation13 + $0x168] ss:$28 sps:$4 sm:$0xff]  }
 0x409   :  { %4376 = vmatprep.subr.bf16.mxu1 %v5999_v14  ;;  %v6073_v22 = vld [vmem:[#allocation13 + $0x4e8] ss:$28 sps:$4 sm:$0xff]   ;;  %v6074_v14 = vld [vmem:[#allocation13 + $0x2f0] ss:$28 sps:$4 sm:$0xff]  }
 0x40b   :  { %4334 = vmatpush1.bf16.msra.mxu0 %v5994_v23  ;;  %v6075_v23 = vld [vmem:[#allocation13 + $0x670] ss:$28 sps:$4 sm:$0xff]  }
 0x40c   :  { %4377 = vmatpush1.bf16.msra.mxu1 %v5997_v24  ;;  %4335 = vmatprep.subr.bf16.mxu0 %v6002_v25  ;;  %v6076_v24 = vld [vmem:[#allocation13 + $0x130] ss:$28 sps:$4 sm:$0xff]  }
 0x40d   :  { %4378 = vmatprep.subr.bf16.mxu1 %v6005_v26  ;;  %v6077_v25 = vld [vmem:[#allocation13 + $0x4b0] ss:$28 sps:$4 sm:$0xff]   ;;  %v6078_v26 = vld [vmem:[#allocation13 + $0x2b8] ss:$28 sps:$4 sm:$0xff]  }
 0x40f   :  { %4336 = vmatpush1.bf16.msra.mxu0 %v6000_v27  ;;  %v6079_v27 = vld [vmem:[#allocation13 + $0x638] ss:$28 sps:$4 sm:$0xff]  }
 0x410   :  { %4379 = vmatpush1.bf16.msra.mxu1 %v6003_v28  ;;  %4337 = vmatprep.subr.bf16.mxu0 %v6008_v29  ;;  %v6080_v28 = vld [vmem:[#allocation13 + $0xf8] ss:$28 sps:$4 sm:$0xff]   ;;  %v6082_v29 = vld [vmem:[#allocation13 + $0x280] ss:$28 sps:$4 sm:$0xff]  }
 0x411   :  { %4380 = vmatprep.subr.bf16.mxu1 %v6011_v51  ;;  %v6083_v51 = vld [vmem:[#allocation13 + $0x600] ss:$28 sps:$4 sm:$0xff]  }
 0x413   :  { %4338 = vmatpush1.bf16.msra.mxu0 %v6006_v30  ;;  %v6085_v30 = vld [vmem:[#allocation13 + $0x440] ss:$28 sps:$4 sm:$0xff]  }
 0x414   :  { %4381 = vmatpush1.bf16.msra.mxu1 %v6009_v31  ;;  %4339 = vmatprep.subr.bf16.mxu0 %v6014_v32  ;;  %v6086_v31 = vld [vmem:[#allocation13 + $0x248] ss:$28 sps:$4 sm:$0xff]  }
 0x415   :  { %4382 = vmatprep.subr.bf16.mxu1 %v6017_v36  ;;  %v6087_v32 = vld [vmem:[#allocation13 + $0x5c8] ss:$28 sps:$4 sm:$0xff]  }
 0x416   :  { %v6088_v36 = vld [vmem:[#allocation13 + $0x88] ss:$28 sps:$4 sm:$0xff]  }
 0x417   :  { %4340 = vmatpush1.bf16.msra.mxu0 %v6012_v37  ;;  %v6089_v37 = vld [vmem:[#allocation13 + $0x408] ss:$28 sps:$4 sm:$0xff]  }
 0x418   :  { %4383 = vmatpush1.bf16.msra.mxu1 %v6015_v38  ;;  %4341 = vmatprep.subr.bf16.mxu0 %v6020_v39  ;;  %v6090_v38 = vld [vmem:[#allocation13 + $0x210] ss:$28 sps:$4 sm:$0xff]  }
 0x419   :  { %4384 = vmatprep.subr.bf16.mxu1 %v6023_v40  ;;  %v6091_v39 = vld [vmem:[#allocation13 + $0x590] ss:$28 sps:$4 sm:$0xff]  }
 0x41a   :  { %v6092_v40 = vld [vmem:[#allocation13 + $0x50] ss:$28 sps:$4 sm:$0xff]  }
 0x41b   :  { %4342 = vmatpush2.bf16.msra.mxu0 %v6018_v41  ;;  %v6093_v41 = vld [vmem:[#allocation13 + $0x3d0] ss:$28 sps:$4 sm:$0xff]  }
 0x41c   :  { %4385 = vmatpush2.bf16.msra.mxu1 %v6021_v42  ;;  %4343 = vmatprep.subr.bf16.mxu0 %v6026_v43  ;;  %v6094_v42 = vld [vmem:[#allocation13 + $0x1d8] ss:$28 sps:$4 sm:$0xff]  }
 0x41d   :  { %4386 = vmatprep.subr.bf16.mxu1 %v6029_v44  ;;  %v6095_v43 = vld [vmem:[#allocation13 + $0x558] ss:$28 sps:$4 sm:$0xff]  }
 0x41e   :  { %v6096_v44 = vld [vmem:[#allocation13 + $0x18] ss:$28 sps:$4 sm:$0xff]  }
 0x41f   :  { %4344 = vmatpush2.bf16.msra.mxu0 %v6024_v45  ;;  %v6097_v45 = vld [vmem:[#allocation13 + $0x398] ss:$28 sps:$4 sm:$0xff]  }
 0x420   :  { %4387 = vmatpush2.bf16.msra.mxu1 %v6027_v46  ;;  %4345 = vmatprep.subr.bf16.mxu0 %v6032_v47  ;;  %v6544_v46 = vld [vmem:[%s6581_s9] sm:$0xff]  ;;  %s6368_s9 = smov [#allocation15]  }
 0x421   :  { %4388 = vmatprep.subr.bf16.mxu1 %v6035_v48  ;;  %v2969_v47 = vrot.slane %v6544_v46, %v6491_v56  ;;  %v2973_v48 = vrot.slane %v6544_v46, %v6488_v55  ;;  %s4636_s18 = sshll.u32 %s6368_s9, 4  ;;  %s4637_s18 = int_to_ptr.vmem [resolvable:$true] %s4636_s18 }
 0x422   :  { %s6300_s20 = scalar_lea.vmem %s4637_s18, 512  ;;  %p6305_p8 = scmp.lt.s32.totalorder %s4637_s18, %s4637_s18 }
 0x423   :  { %4346 = vmatpush2.bf16.msra.mxu0 %v6030_v50  ;;  %p6301_p7 = scmp.ne.s32.totalorder %s4637_s18, %s6300_s20  ;;  %p6306_p9 = scmp.lt.s32.totalorder %s6300_s20, %s6300_s20 }
 0x424   :  { %4389 = vmatpush2.bf16.msra.mxu1 %v6033_v53  ;;  %4347 = vmatprep.subr.bf16.mxu0 %v6038_v54 }
 0x425   :  { %4390 = vmatprep.subr.bf16.mxu1 %v6041_v57  ;;  %p6307_p10 = por %p6306_p9, %p6305_p8 }
 0x427   :  { %4348 = vmatpush2.bf16.msra.mxu0 %v6036_v58  ;;  %p6308_p11 = pnand %p6307_p10, %p6301_p7 }
 0x428   :  { %4391 = vmatpush2.bf16.msra.mxu1 %v6039_v4  ;;  %4349 = vmatprep.subr.bf16.mxu0 %v6044_v11 }
 0x429   :  { %4392 = vmatprep.subr.bf16.mxu1 %v6047_v61 }
 0x42b   :  { %4350 = vmatpush2.bf16.msra.mxu0 %v6042_v63 }
 0x42c   :  { %4393 = vmatpush2.bf16.msra.mxu1 %v6045_v0  ;;  %4351 = vmatprep.subr.bf16.mxu0 %v6050_v35 }
 0x42d   :  { %4394 = vmatprep.subr.bf16.mxu1 %v6053_v1 }
 0x42f   :  { %4352 = vmatpush2.bf16.msra.mxu0 %v6048_v2 }
 0x430   :  { %4395 = vmatpush2.bf16.msra.mxu1 %v6051_v3  ;;  %4353 = vmatprep.subr.bf16.mxu0 %v6056_v5 }
 0x431   :  { %4396 = vmatprep.subr.bf16.mxu1 %v6059_v6 }
 0x433   :  { %4354 = vmatpush2.bf16.msra.mxu0 %v6054_v7 }
 0x434   :  { %4397 = vmatpush2.bf16.msra.mxu1 %v6057_v8  ;;  %4355 = vmatprep.subr.bf16.mxu0 %v6062_v9 }
 0x435   :  { %4398 = vmatprep.subr.bf16.mxu1 %v6065_v10 }
 0x437   :  { %4356 = vmatpush2.bf16.msra.mxu0 %v6060_v12 }
 0x438   :  { %4399 = vmatpush2.bf16.msra.mxu1 %v6063_v13  ;;  %5226 = vmatprep.subr.bf16.mxu0 %v6066_v15 }
 0x439   :  { %5248 = vmatprep.subr.bf16.mxu1 %v6067_v16 }
 0x43a   :  { %4358 = vmatmul.mubr.bf16.vlgmr.msra.gmra.mxu0 %v6521_v59 }
 0x43b   :  { %4401 = vmatmul.mubr.bf16.vlgmr.msra.gmra.mxu1 %v6523_v62  ;;  %5227 = vmatpush3.bf16.msra.mxu0 %v6068_v17 }
 0x43c   :  { %4443 = vmatprep.mubr.bf16.mxu0 %v6517_v49  ;;  %5249 = vmatpush3.bf16.msra.mxu1 %v6069_v18  ;;  %v6081_v49 = vld [vmem:[#allocation13 + $0x478] ss:$28 sps:$4 sm:$0xff]  }
 0x43d   :  { %4484 = vmatprep.mubr.bf16.mxu1 %v6519_v60  ;;  %5228 = vmatprep.subr.bf16.mxu0 %v6070_v19  ;;  %v6084_v60 = vld [vmem:[#allocation13 + $0xc0] ss:$28 sps:$4 sm:$0xff]  }
 0x43e   :  { %5250 = vmatprep.subr.bf16.mxu1 %v6071_v20 }
 0x43f   :  { %5229 = vmatpush3.bf16.msra.mxu0 %v6072_v21 }
 0x440   :  { %5251 = vmatpush3.bf16.msra.mxu1 %v6073_v22  ;;  %5230 = vmatprep.subr.bf16.mxu0 %v6074_v14 }
 0x441   :  { %5252 = vmatprep.subr.bf16.mxu1 %v6075_v23 }
 0x443   :  { %5231 = vmatpush3.bf16.msra.mxu0 %v6076_v24 }
 0x444   :  { %5253 = vmatpush3.bf16.msra.mxu1 %v6077_v25  ;;  %5232 = vmatprep.subr.bf16.mxu0 %v6078_v26  ;;  %v2977_v26 = vrot.slane %v6544_v46, %v6503_v34 }
 0x445   :  { %5254 = vmatprep.subr.bf16.mxu1 %v6079_v27  ;;  %v2981_v27 = vrot.slane %v6544_v46, %v6500_v33 }
 0x447   :  { %5233 = vmatpush3.bf16.msra.mxu0 %v6080_v28 }
 0x448   :  { %5255 = vmatpush3.bf16.msra.mxu1 %v6081_v49  ;;  %5234 = vmatprep.subr.bf16.mxu0 %v6082_v29 }
 0x449   :  { %5256 = vmatprep.subr.bf16.mxu1 %v6083_v51 }
 0x44b   :  { %5235 = vmatpush3.bf16.msra.mxu0 %v6084_v60 }
 0x44c   :  { %5257 = vmatpush3.bf16.msra.mxu1 %v6085_v30  ;;  %5236 = vmatprep.subr.bf16.mxu0 %v6086_v31 }
 0x44d   :  { %5258 = vmatprep.subr.bf16.mxu1 %v6087_v32 }
 0x44f   :  { %5237 = vmatpush3.bf16.msra.mxu0 %v6088_v36 }
 0x450   :  { %5259 = vmatpush3.bf16.msra.mxu1 %v6089_v37  ;;  %5238 = vmatprep.subr.bf16.mxu0 %v6090_v38 }
 0x451   :  { %5260 = vmatprep.subr.bf16.mxu1 %v6091_v39 }
 0x453   :  { %5239 = vmatpush3.bf16.msra.mxu0 %v6092_v40 }
 0x454   :  { %5261 = vmatpush3.bf16.msra.mxu1 %v6093_v41  ;;  %5240 = vmatprep.subr.bf16.mxu0 %v6094_v42 }
 0x455   :  { %5262 = vmatprep.subr.bf16.mxu1 %v6095_v43 }
 0x457   :  { %5241 = vmatpush3.bf16.msra.mxu0 %v6096_v44 }
 0x458   :  { %5263 = vmatpush3.bf16.msra.mxu1 %v6097_v45 }
 0x45a   :  { %4444 = vmatmul.mubr.bf16.vlgmr.msra.gmra.mxu0 %v6521_v59 }
 0x45b   :  { %4485 = vmatmul.mubr.bf16.vlgmr.msra.gmra.mxu1 %v6523_v62 }
 0x47a   :  { %v4187_v50 = vpop.f32.mrf.mxu0  ;;  %v4230_v53 = vpop.f32.mrf.mxu1 }
 0x47b   :  { %v4188_v54 = vadd.f32 %v4187_v50, %v2969_v47 }
 0x47c   :  { %v4189_v57 = vpop.f32.mrf.mxu0  ;;  %v4232_v58 = vpop.f32.mrf.mxu1 }
 0x47d   :  { %v4231_v4 = vadd.f32 %v4230_v53, %v4188_v54  ;;  %v4190_v59 = vadd.f32 %v4189_v57, %v2973_v48 }
 0x47e   :  { %v4191_v11 = vpop.f32.mrf.mxu0  ;;  %v4234_v62 = vpop.f32.mrf.mxu1 }
 0x47f   :  { %v4493_v61 = vsub.f32 0.0, %v4231_v4  ;;  %v4233_v63 = vadd.f32 %v4232_v58, %v4190_v59  ;;  %v4192_v0 = vadd.f32 %v4191_v11, %v2969_v47 }
 0x480   :  { %v4193_v35 = vpop.f32.mrf.mxu0  ;;  %v4236_v5 = vpop.f32.mrf.mxu1 }
 0x481   :  { %v4507_v1 = vmul.f32 1.442695, %v4493_v61  ;;  %v4494_v2 = vsub.f32 0.0, %v4233_v63  ;;  %v4235_v3 = vadd.f32 %v4234_v62, %v4192_v0  ;;  %v4194_v56 = vadd.f32 %v4193_v35, %v2973_v48 }
 0x483   :  { %6102 = vpow2.f32 %v4507_v1  ;;  %v4509_v55 = vmul.f32 1.442695, %v4494_v2  ;;  %v4500_v6 = vsub.f32 0.0, %v4235_v3  ;;  %v4237_v7 = vadd.f32 %v4236_v5, %v4194_v56 }
 0x485   :  { %6104 = vpow2.f32 %v4509_v55  ;;  %v4521_v8 = vmul.f32 1.442695, %v4500_v6  ;;  %v4501_v9 = vsub.f32 0.0, %v4237_v7 }
 0x487   :  { %6106 = vpow2.f32 %v4521_v8  ;;  %v4523_v10 = vmul.f32 1.442695, %v4501_v9 }
 0x489   :  { %6108 = vpow2.f32 %v4523_v10 }
 0x490   :  { %v6103_v12 = vpop.eup %6102 }
 0x491   :  { %v4535_v13 = vadd.f32 1.0, %v6103_v12 }
 0x492   :  { %v6105_v15 = vpop.eup %6104 }
 0x493   :  { %v4536_v16 = vadd.f32 1.0, %v6105_v15  ;;  %6110 = vrcp.f32 %v4535_v13 }
 0x494   :  { %v6107_v17 = vpop.eup %6106 }
 0x495   :  { %6112 = vrcp.f32 %v4536_v16  ;;  %v4542_v18 = vadd.f32 1.0, %v6107_v17 }
 0x496   :  { %v6109_v19 = vpop.eup %6108 }
 0x497   :  { %v4543_v20 = vadd.f32 1.0, %v6109_v19  ;;  %6114 = vrcp.f32 %v4542_v18 }
 0x499   :  { %6116 = vrcp.f32 %v4543_v20 }
 0x4a0   :  { %v6111_v21 = vpop.eup %6110 }
 0x4a2   :  { %v6113_v22 = vpop.eup %6112 }
 0x4a3   :  { %v5214_v14 = vpack.c.bf16 %v6113_v22, %v6111_v21 }
 0x4a4   :  { %v6115_v23 = vpop.eup %6114 }
 0x4a5   :  { %4607 = vst [vmem:[#allocation14] sm:$0xff] %v5214_v14 }
 0x4a6   :  { %v6117_v24 = vpop.eup %6116 }
 0x4a7   :  { %v5218_v25 = vpack.c.bf16 %v6117_v24, %v6115_v23 }
 0x4a9   :  { %4611 = vst [vmem:[#allocation14 + $0x1c] sm:$0xff] %v5218_v25 }
 0x4ba   :  { %v4273_v28 = vpop.f32.mrf.mxu0  ;;  %v4316_v49 = vpop.f32.mrf.mxu1 }
 0x4bb   :  { %v4274_v29 = vadd.f32 %v4273_v28, %v2977_v26 }
 0x4bc   :  { %v4275_v51 = vpop.f32.mrf.mxu0  ;;  %v4318_v60 = vpop.f32.mrf.mxu1 }
 0x4bd   :  { %v4317_v30 = vadd.f32 %v4316_v49, %v4274_v29  ;;  %v4276_v31 = vadd.f32 %v4275_v51, %v2981_v27 }
 0x4be   :  { %v4277_v32 = vpop.f32.mrf.mxu0  ;;  %v4320_v36 = vpop.f32.mrf.mxu1 }
 0x4bf   :  { %v4495_v37 = vsub.f32 0.0, %v4317_v30  ;;  %v4319_v38 = vadd.f32 %v4318_v60, %v4276_v31  ;;  %v4278_v39 = vadd.f32 %v4277_v32, %v2977_v26 }
 0x4c0   :  { %v4279_v40 = vpop.f32.mrf.mxu0  ;;  %v4322_v44 = vpop.f32.mrf.mxu1 }
 0x4c1   :  { %v4511_v41 = vmul.f32 1.442695, %v4495_v37  ;;  %v4496_v42 = vsub.f32 0.0, %v4319_v38  ;;  %v4321_v43 = vadd.f32 %v4320_v36, %v4278_v39  ;;  %v4280_v34 = vadd.f32 %v4279_v40, %v2981_v27 }
 0x4c3   :  { %6118 = vpow2.f32 %v4511_v41  ;;  %v4513_v33 = vmul.f32 1.442695, %v4496_v42  ;;  %v4502_v45 = vsub.f32 0.0, %v4321_v43  ;;  %v4323_v47 = vadd.f32 %v4322_v44, %v4280_v34 }
 0x4c5   :  { %6120 = vpow2.f32 %v4513_v33  ;;  %v4525_v48 = vmul.f32 1.442695, %v4502_v45  ;;  %v4503_v50 = vsub.f32 0.0, %v4323_v47 }
 0x4c7   :  { %6122 = vpow2.f32 %v4525_v48  ;;  %v4527_v53 = vmul.f32 1.442695, %v4503_v50 }
 0x4c9   :  { %6124 = vpow2.f32 %v4527_v53 }
 0x4ca   :  { %6311 = shalt.err (!%p6308_p11)
}
 0x4cb   :  { %4642 = dma.vmem_to_hbm [thread:$0]  %s4637_s18, 512, %s6583_s11, [#allocation16], %s6363_s24, %s6363_s24, %s6364_s25   ;;  %v2984_v56 = vsub.s32 4, %v6485_v52  ;;  %v2988_v5 = vsub.s32 5, %v6485_v52  ;;  %v2992_v40 = vsub.s32 6, %v6485_v52 }
 0x4cc   :  { %s6369_s11 = smov [#allocation14]  }
 0x4cd   :  { %v2985_v55 = vrot.slane %v6544_v46, %v2984_v56  ;;  %v2989_v6 = vrot.slane %v6544_v46, %v2988_v5  ;;  %v2993_v43 = vrot.slane %v6544_v46, %v2992_v40  ;;  %s4624_s23 = sshll.u32 %s6369_s11, 4  ;;  %s4625_s23 = int_to_ptr.vmem [resolvable:$true] %s4624_s23 }
 0x4ce   :  { %s6320_s7 = scalar_lea.vmem %s4625_s23, 896  ;;  %p6325_p13 = scmp.lt.s32.totalorder %s4625_s23, %s4625_s23 }
 0x4cf   :  { %p6321_p12 = scmp.ne.s32.totalorder %s4625_s23, %s6320_s7  ;;  %p6326_p0 = scmp.lt.s32.totalorder %s6320_s7, %s6320_s7 }
 0x4d0   :  { %v6119_v54 = vpop.eup %6118 }
 0x4d1   :  { %v4537_v57 = vadd.f32 1.0, %v6119_v54  ;;  %p6327_p1 = por %p6326_p0, %p6325_p13 }
 0x4d2   :  { %v6121_v58 = vpop.eup %6120 }
 0x4d3   :  { %v4538_v4 = vadd.f32 1.0, %v6121_v58  ;;  %6126 = vrcp.f32 %v4537_v57  ;;  %p6328_p2 = pnand %p6327_p1, %p6321_p12 }
 0x4d4   :  { %v6123_v59 = vpop.eup %6122 }
 0x4d5   :  { %6128 = vrcp.f32 %v4538_v4  ;;  %v4544_v11 = vadd.f32 1.0, %v6123_v59 }
 0x4d6   :  { %v6125_v62 = vpop.eup %6124 }
 0x4d7   :  { %v4545_v61 = vadd.f32 1.0, %v6125_v62  ;;  %6130 = vrcp.f32 %v4544_v11 }
 0x4d9   :  { %6132 = vrcp.f32 %v4545_v61 }
 0x4e0   :  { %v6127_v63 = vpop.eup %6126 }
 0x4e2   :  { %v6129_v0 = vpop.eup %6128 }
 0x4e3   :  { %v5215_v35 = vpack.c.bf16 %v6129_v0, %v6127_v63 }
 0x4e4   :  { %v6131_v1 = vpop.eup %6130 }
 0x4e5   :  { %4608 = vst [vmem:[#allocation14 + $0x8] sm:$0xff] %v5215_v35 }
 0x4e6   :  { %v6133_v2 = vpop.eup %6132 }
 0x4e7   :  { %v5219_v3 = vpack.c.bf16 %v6133_v2, %v6131_v1 }
 0x4e9   :  { %4612 = vst [vmem:[#allocation14 + $0x24] sm:$0xff] %v5219_v3 }
 0x4fa   :  { %v4359_v7 = vpop.f32.mrf.mxu0 }
 0x4fb   :  { %v4360_v8 = vadd.f32 %v4359_v7, %v2985_v55  ;;  %v4402_v9 = vpop.f32.mrf.mxu1 }
 0x4fc   :  { %v4361_v10 = vpop.f32.mrf.mxu0 }
 0x4fd   :  { %v4403_v12 = vadd.f32 %v4402_v9, %v4360_v8  ;;  %v4362_v13 = vadd.f32 %v4361_v10, %v2989_v6  ;;  %v4404_v15 = vpop.f32.mrf.mxu1 }
 0x4fe   :  { %v4363_v16 = vpop.f32.mrf.mxu0 }
 0x4ff   :  { %v4497_v17 = vsub.f32 0.0, %v4403_v12  ;;  %v4405_v18 = vadd.f32 %v4404_v15, %v4362_v13  ;;  %v4364_v19 = vadd.f32 %v4363_v16, %v2985_v55  ;;  %v4406_v20 = vpop.f32.mrf.mxu1 }
 0x500   :  { %v4365_v21 = vpop.f32.mrf.mxu0 }
 0x501   :  { %v4515_v22 = vmul.f32 1.442695, %v4497_v17  ;;  %v4498_v14 = vsub.f32 0.0, %v4405_v18  ;;  %v4407_v23 = vadd.f32 %v4406_v20, %v4364_v19  ;;  %v4366_v24 = vadd.f32 %v4365_v21, %v2989_v6  ;;  %v4408_v25 = vpop.f32.mrf.mxu1 }
 0x503   :  { %6134 = vpow2.f32 %v4515_v22  ;;  %v4517_v26 = vmul.f32 1.442695, %v4498_v14  ;;  %v4504_v27 = vsub.f32 0.0, %v4407_v23  ;;  %v4409_v28 = vadd.f32 %v4408_v25, %v4366_v24 }
 0x505   :  { %6136 = vpow2.f32 %v4517_v26  ;;  %v4529_v49 = vmul.f32 1.442695, %v4504_v27  ;;  %v4505_v29 = vsub.f32 0.0, %v4409_v28 }
 0x507   :  { %6138 = vpow2.f32 %v4529_v49  ;;  %v4531_v51 = vmul.f32 1.442695, %v4505_v29 }
 0x509   :  { %6140 = vpow2.f32 %v4531_v51 }
 0x510   :  { %v6135_v60 = vpop.eup %6134 }
 0x511   :  { %v4539_v30 = vadd.f32 1.0, %v6135_v60 }
 0x512   :  { %v6137_v31 = vpop.eup %6136 }
 0x513   :  { %v4540_v32 = vadd.f32 1.0, %v6137_v31  ;;  %6142 = vrcp.f32 %v4539_v30 }
 0x514   :  { %v6139_v36 = vpop.eup %6138 }
 0x515   :  { %6144 = vrcp.f32 %v4540_v32  ;;  %v4546_v37 = vadd.f32 1.0, %v6139_v36 }
 0x516   :  { %v6141_v38 = vpop.eup %6140 }
 0x517   :  { %v4547_v39 = vadd.f32 1.0, %v6141_v38  ;;  %6146 = vrcp.f32 %v4546_v37 }
 0x519   :  { %6148 = vrcp.f32 %v4547_v39 }
 0x51a   :  { %v5242_v41 = vpop.f32.mrf.mxu0 }
 0x51b   :  { %v5264_v42 = vpop.f32.mrf.mxu1 }
 0x51c   :  { %v5243_v34 = vpop.f32.mrf.mxu0 }
 0x51d   :  { %v5244_v44 = vadd.f32 %v5243_v34, %v5242_v41  ;;  %v5265_v33 = vpop.f32.mrf.mxu1 }
 0x51e   :  { %v5245_v45 = vpop.f32.mrf.mxu0  ;;  %v5266_v48 = vadd.f32 %v5265_v33, %v5264_v42 }
 0x51f   :  { %v4446_v47 = vadd.f32 %v5244_v44, %v2993_v43  ;;  %v5267_v50 = vpop.f32.mrf.mxu1 }
 0x520   :  { %v5246_v53 = vpop.f32.mrf.mxu0  ;;  %v6143_v54 = vpop.eup %6142 }
 0x521   :  { %v4487_v57 = vadd.f32 %v5266_v48, %v4446_v47  ;;  %v5247_v58 = vadd.f32 %v5246_v53, %v5245_v45  ;;  %v5268_v4 = vpop.f32.mrf.mxu1 }
 0x522   :  { %v6145_v59 = vpop.eup %6144  ;;  %v5269_v61 = vadd.f32 %v5268_v4, %v5267_v50 }
 0x523   :  { %v5216_v52 = vpack.c.bf16 %v6145_v59, %v6143_v54  ;;  %v4499_v11 = vsub.f32 0.0, %v4487_v57  ;;  %v4449_v62 = vadd.f32 %v5247_v58, %v2993_v43 }
 0x524   :  { %v6147_v63 = vpop.eup %6146 }
 0x525   :  { %4609 = vst [vmem:[#allocation14 + $0x10] sm:$0xff] %v5216_v52  ;;  %v4519_v46 = vmul.f32 1.442695, %v4499_v11  ;;  %v4490_v0 = vadd.f32 %v5269_v61, %v4449_v62 }
 0x526   :  { %v6149_v35 = vpop.eup %6148 }
 0x527   :  { %v5220_v1 = vpack.c.bf16 %v6149_v35, %v6147_v63  ;;  %6150 = vpow2.f32 %v4519_v46  ;;  %v4506_v2 = vsub.f32 0.0, %v4490_v0 }
 0x529   :  { %4613 = vst [vmem:[#allocation14 + $0x2c] sm:$0xff] %v5220_v1  ;;  %v4533_v3 = vmul.f32 1.442695, %v4506_v2 }
 0x52b   :  { %6152 = vpow2.f32 %v4533_v3 }
 0x534   :  { %v6151_v56 = vpop.eup %6150 }
 0x535   :  { %v4541_v5 = vadd.f32 1.0, %v6151_v56 }
 0x537   :  { %6154 = vrcp.f32 %v4541_v5 }
 0x538   :  { %v6153_v55 = vpop.eup %6152 }
 0x539   :  { %v4548_v6 = vadd.f32 1.0, %v6153_v55 }
 0x53b   :  { %6156 = vrcp.f32 %v4548_v6 }
 0x544   :  { %v6155_v7 = vpop.eup %6154 }
 0x545   :  { %v5217_v8 = vpack.c.bf16 %v6155_v7, %v6155_v7 }
 0x547   :  { %4610 = vst [vmem:[#allocation14 + $0x18] sm:$0xf] %v5217_v8 }
 0x548   :  { %v6157_v9 = vpop.eup %6156 }
 0x549   :  { %v5221_v10 = vpack.c.bf16 %v6157_v9, %v6157_v9 }
 0x54b   :  { %4614 = vst [vmem:[#allocation14 + $0x34] sm:$0xf] %v5221_v10 }
 0x54c   :  { %6331 = shalt.err (!%p6328_p2)
}
 0x54d   :  { %4630 = dma.vmem_to_hbm [thread:$0]  %s4625_s23, 896, %s6582_s10, [#allocation4], %s6360_s4, %s6360_s4, %s6361_s19  }
 0x54e   :  { %6348 = dma.done.wait [#allocation4], 896  }
 0x54f   :  { %6349 = vsyncadd [#allocation4], 4294966400 }
 0x550   :  { %6350 = dma.done.wait [#allocation16], 512  }
 0x551   :  { %6351 = vsyncadd [#allocation16], 4294966784 }
 0x552   :  { %4649 = vsyncpa [#allocation3], 1 }
 0x553   :  { %4650 = vsyncpa [#allocation6], 1 }
 0x554   :  { %4651 = vsyncpa [#allocation9], 1 }
 0x555   :  { %4652 = vsyncpa [#allocation12], 1 }
 0x556   :  { %4653 = vsyncpa [#allocation4], 1 }
 0x557   :  { %4654 = vsyncpa [#allocation16], 1 }

</bundles_post_ra>
